<compile_context>
chip_gen: v7x
topology: tpu7x:2x2x1
jax: 0.10.0
libtpu: 0.0.40
codegen_flags: <defaults>
</compile_context>

<pallas_src>
import jax
import jax.numpy as jnp
from jax import lax
from jax.experimental import pallas as pl
from jax.experimental.pallas import tpu as pltpu
import numpy as np


def rnn_kernel(x_ref, w_ih_ref, w_hh_ref, b_ref, out_ref):
    """Grid: (batch_block, layer).  Layer axis is sequential ("arbitrary").

    x_ref:    (S, Bb, H)  bf16 input sequence block (only read at layer 0)
    w_ih_ref: (1, H, H)   this layer's input->hidden weight (transposed), bf16
    w_hh_ref: (1, H, H)   this layer's hidden->hidden weight (transposed), bf16
    b_ref:    (1, 1, H)   combined bias (b_ih + b_hh), f32
    out_ref:  (S, Bb, H)  f32, resident across the layer axis: previous layer's
                          output on entry, overwritten with this layer's output.
    """
    layer = pl.program_id(1)
    S, B, H = out_ref.shape

    w_ih = w_ih_ref[0]            # (H, H) bf16
    w_hh = w_hh_ref[0]            # (H, H) bf16
    bias = b_ref[0]               # (1, H) f32

    # ---- Hoisted input projection: one large MXU matmul over all timesteps.
    # pre[t] = src[t] @ W_ih + bias, written back into out_ref (each row is
    # read per step before being overwritten by h_t -> no (S,B,H) scratch).
    @pl.when(layer == 0)
    def _():
        src = x_ref[...].reshape(S * B, H)                   # already bf16
        pre = jnp.dot(src, w_ih, preferred_element_type=jnp.float32) + bias
        out_ref[...] = pre.reshape(S, B, H)

    @pl.when(layer != 0)
    def _():
        src = out_ref[...].reshape(S * B, H).astype(jnp.bfloat16)
        pre = jnp.dot(src, w_ih, preferred_element_type=jnp.float32) + bias
        out_ref[...] = pre.reshape(S, B, H)

    # ---- Serial recurrence: only h @ W_hh remains inside the loop.
    # TODO(synk): hold W_hh in MXU weight registers across the loop
    # (pltpu.matmul_push_rhs once per layer + matmul_acc_lhs/matmul_pop per
    # step) to stop re-streaming the weight plane each latency-bound step;
    # not emitted here because the pop/accumulator-reset semantics of the
    # explicit MXU API could not be verified without hardware.
    def step(t, h):
        h_new = jnp.tanh(
            out_ref[t]
            + jnp.dot(h.astype(jnp.bfloat16), w_hh,
                      preferred_element_type=jnp.float32)
        )
        out_ref[t] = h_new
        return h_new

    if S <= 32:
        unroll = True
    elif H >= 1024:
        unroll = 2          # keep vreg pressure off the serial critical path
    else:
        unroll = 8
    lax.fori_loop(0, S, step, jnp.zeros((B, H), jnp.float32), unroll=unroll)


def _round_up(x, m):
    return (x + m - 1) // m * m


def _tensorcores_per_chip():
    """2 on v7x, 1 on v5e/v6e (and on anything we cannot identify)."""
    try:
        kind = jax.devices()[0].device_kind.lower()
    except Exception:
        return 1
    return 2 if ("v7" in kind or "7x" in kind) else 1


def _vmem_capacity_bytes():
    try:
        return int(pltpu.get_tpu_info().vmem_capacity_bytes)
    except Exception:
        return 64 << 20      # conservative (v7x physical)


def rnn_forward(x, w_ih, w_hh, b_ih, b_hh, *, batch_first=True):
    """x: (B, S, H) f32 (or (S, B, H) if batch_first=False);
    weights pre-transposed (L, H_in, H); biases (L, 1, H).
    Returns the nn.RNN(batch_first=True) output (same layout as the input)."""
    if batch_first:
        B, S, H = x.shape
        x_sbh = jnp.transpose(x, (1, 0, 2))                   # (S, B, H)
    else:
        S, B, H = x.shape
        x_sbh = x
    L = w_ih.shape[0]
    # This kernel assumes input_size == hidden_size (as in the benchmark spec).
    assert w_ih.shape[1] == H and w_ih.shape[2] == H, \
        "rnn_forward requires input_size == hidden_size"

    # Lane/sublane-dense padding: H -> multiple of 128; B -> multiple of 16
    # (bf16 x block needs a 16-row sublane-dense second-minor dim).
    B_pad = _round_up(B, 16)
    H_pad = _round_up(H, 128)

    x_sbh = jnp.pad(x_sbh.astype(jnp.bfloat16),
                    ((0, 0), (0, B_pad - B), (0, H_pad - H)))

    # Pre-cast weights to bf16 once (MXU-native); zero padding keeps padded
    # lanes exactly zero through the recurrence.
    w_ih_p = jnp.pad(w_ih, ((0, 0), (0, H_pad - H), (0, H_pad - H))
                     ).astype(jnp.bfloat16)
    w_hh_p = jnp.pad(w_hh, ((0, 0), (0, H_pad - H), (0, H_pad - H))
                     ).astype(jnp.bfloat16)
    bias = jnp.pad(b_ih + b_hh, ((0, 0), (0, 0), (0, H_pad - H)))  # (L,1,Hp) f32

    # Batch-block split only where there are 2 TensorCores to use it (v7x).
    n_tc = _tensorcores_per_chip()
    if n_tc >= 2 and B_pad % 32 == 0:
        b_blk = B_pad // 2
        n_b = 2
    else:
        b_blk = B_pad
        n_b = 1

    # ---- VMEM budget --------------------------------------------------------
    x_blk_bytes = S * b_blk * H_pad * 2          # bf16
    out_blk_bytes = S * b_blk * H_pad * 4        # f32
    big_bytes = x_blk_bytes + out_blk_bytes
    w_bytes = 2 * (H_pad * H_pad * 2) * 2        # two weights, double-buffered
    # Only bother dropping the buffer count on the big blocks when it matters;
    # their block index never changes across the layer axis anyway.
    use_min_buffering = big_bytes > (8 << 20)
    bufs = 1 if use_min_buffering else 2
    needed = big_bytes * bufs + w_bytes + bias.size * 4 + (2 << 20)  # + headroom
    cap = _vmem_capacity_bytes()
    vmem_limit = int(min(max(int(needed * 1.5), 32 << 20), int(cap * 0.9)))
    # TODO(synk): if `needed` exceeds ~0.9*cap (very long S on v7x), switch to
    # an S-chunked grid axis with the hidden state carried in a VMEM scratch.

    cost = pl.CostEstimate(
        flops=int(4 * L * S * B_pad * H_pad * H_pad),        # 2 matmuls/step
        transcendentals=int(L * S * B_pad * H_pad),           # tanh
        bytes_accessed=int(x_sbh.size * 2 + w_ih_p.size * 2 + w_hh_p.size * 2
                           + bias.size * 4 + S * B_pad * H_pad * 4),
    )

    def _run(dim_sem, min_buffer):
        pm = dict(pipeline_mode=pl.Buffered(1)) if min_buffer else {}
        grid_spec = pltpu.PrefetchScalarGridSpec(
            num_scalar_prefetch=0,
            grid=(n_b, L),
            in_specs=[
                pl.BlockSpec((S, b_blk, H_pad), lambda b, l: (0, b, 0), **pm),
                pl.BlockSpec((1, H_pad, H_pad), lambda b, l: (l, 0, 0)),
                pl.BlockSpec((1, H_pad, H_pad), lambda b, l: (l, 0, 0)),
                pl.BlockSpec((1, 1, H_pad), lambda b, l: (l, 0, 0)),
            ],
            # Same output block index across the layer axis -> stays resident
            # in VMEM for the whole layer loop (accumulator pattern).
            out_specs=pl.BlockSpec((S, b_blk, H_pad), lambda b, l: (0, b, 0),
                                   **pm),
        )
        return pl.pallas_call(
            rnn_kernel,
            out_shape=jax.ShapeDtypeStruct((S, B_pad, H_pad), jnp.float32),
            grid_spec=grid_spec,
            compiler_params=pltpu.CompilerParams(
                dimension_semantics=dim_sem,
                vmem_limit_bytes=vmem_limit),
            cost_estimate=cost,
        )(x_sbh, w_ih_p, w_hh_p, bias)

    # Attempt list: preferred semantics/buffering first, safe fallbacks after.
    attempts = []
    if n_b == 2:
        core_par = getattr(pltpu, "CORE_PARALLEL", None)
        arb = getattr(pltpu, "ARBITRARY", "arbitrary")
        if core_par is not None:
            attempts.append(((core_par, arb), use_min_buffering))
        attempts.append((("parallel", "arbitrary"), use_min_buffering))
        if use_min_buffering:
            attempts.append((("parallel", "arbitrary"), False))
    else:
        attempts.append((("arbitrary", "arbitrary"), use_min_buffering))
        if use_min_buffering:
            attempts.append((("arbitrary", "arbitrary"), False))

    out_sbh = None
    last_err = None
    for dim_sem, mb in attempts:
        try:
            out_sbh = _run(dim_sem, mb)
            break
        except Exception as e:                     # fall back to safer config
            last_err = e
    if out_sbh is None:
        raise last_err

    out = out_sbh[:, :B, :H]                                   # strip padding
    if batch_first:
        return jnp.transpose(out, (1, 0, 2))                   # back to (B,S,H)
    return out


def rnn_reference(x, w_ih, w_hh, b_ih, b_hh):
    """Pure-JAX f32 reference of the stacked tanh RNN (sanity check)."""
    B, S, H = x.shape
    L = w_ih.shape[0]
    inp = x
    for l in range(L):
        h = jnp.zeros((B, H), jnp.float32)
        outs = []
        for t in range(S):
            h = jnp.tanh(inp[:, t, :] @ w_ih[l] + h @ w_hh[l]
                         + b_ih[l, 0] + b_hh[l, 0])
            outs.append(h)
        inp = jnp.stack(outs, axis=1)
    return inp


if __name__ == "__main__":
    # Small shapes consistent with the module: input_size == hidden_size.
    batch = 2
    seq_len = 8
    hidden_size = 32
    input_size = hidden_size
    num_layers = 2

    key = jax.random.PRNGKey(0)
    kx, kwi, kwh, kbi, kbh = jax.random.split(key, 5)

    # PyTorch nn.RNN default init: U(-1/sqrt(H), 1/sqrt(H)).
    bound = 1.0 / np.sqrt(hidden_size)
    x = jax.random.normal(kx, (batch, seq_len, input_size), dtype=jnp.float32)
    # Weights stored already transposed: (L, H_in, H) so the kernel does x @ W.
    w_ih = jax.random.uniform(kwi, (num_layers, input_size, hidden_size),
                              minval=-bound, maxval=bound, dtype=jnp.float32)
    w_hh = jax.random.uniform(kwh, (num_layers, hidden_size, hidden_size),
                              minval=-bound, maxval=bound, dtype=jnp.float32)
    b_ih = jax.random.uniform(kbi, (num_layers, 1, hidden_size),
                              minval=-bound, maxval=bound, dtype=jnp.float32)
    b_hh = jax.random.uniform(kbh, (num_layers, 1, hidden_size),
                              minval=-bound, maxval=bound, dtype=jnp.float32)

    out = rnn_forward(x, w_ih, w_hh, b_ih, b_hh)
    out = jax.block_until_ready(out)

    ref = jax.block_until_ready(rnn_reference(x, w_ih, w_hh, b_ih, b_hh))
    np.testing.assert_allclose(np.asarray(out), np.asarray(ref),
                               rtol=5e-2, atol=5e-2)

    assert out.shape == (batch, seq_len, hidden_size)
    print("KERNEL_OK")
</pallas_src>

<mosaic_0001>
module attributes {stable_mosaic.version = 11 : i64} {
  func.func @rnn_kernel(%arg0: i32, %arg1: i32, %arg2: memref<8x16x128xbf16, #tpu.memory_space<vmem>>, %arg3: memref<1x128x128xbf16, #tpu.memory_space<vmem>>, %arg4: memref<1x128x128xbf16, #tpu.memory_space<vmem>>, %arg5: memref<1x1x128xf32, #tpu.memory_space<vmem>>, %arg6: memref<8x16x128xf32, #tpu.memory_space<vmem>>) attributes {dimension_semantics = [#tpu.dimension_semantics<arbitrary>, #tpu.dimension_semantics<arbitrary>], iteration_bounds = array<i64: 1, 2>, scalar_prefetch = 0 : i64, scratch_operands = 0 : i64, tpu.core_type = #tpu.core_type<tc>, window_params = [{transform_indices = @transform_0, window_bounds = array<i64: 8, 16, 128>}, {transform_indices = @transform_1, window_bounds = array<i64: 1, 128, 128>}, {transform_indices = @transform_2, window_bounds = array<i64: 1, 128, 128>}, {transform_indices = @transform_3, window_bounds = array<i64: 1, 1, 128>}, {transform_indices = @transform_4, window_bounds = array<i64: 8, 16, 128>}]} {
    %c0 = arith.constant 0 : index
    %c0_0 = arith.constant 0 : index
    %c0_1 = arith.constant 0 : index
    %0 = vector.load %arg3[%c0, %c0_0, %c0_1] : memref<1x128x128xbf16, #tpu.memory_space<vmem>>, vector<1x128x128xbf16>
    %1 = vector.shape_cast %0 : vector<1x128x128xbf16> to vector<128x128xbf16>
    %c0_2 = arith.constant 0 : index
    %c0_3 = arith.constant 0 : index
    %c0_4 = arith.constant 0 : index
    %2 = vector.load %arg4[%c0_2, %c0_3, %c0_4] : memref<1x128x128xbf16, #tpu.memory_space<vmem>>, vector<1x128x128xbf16>
    %3 = vector.shape_cast %2 : vector<1x128x128xbf16> to vector<128x128xbf16>
    %c0_5 = arith.constant 0 : index
    %c0_6 = arith.constant 0 : index
    %c0_7 = arith.constant 0 : index
    %4 = vector.load %arg5[%c0_5, %c0_6, %c0_7] : memref<1x1x128xf32, #tpu.memory_space<vmem>>, vector<1x1x128xf32>
    %5 = vector.shape_cast %4 : vector<1x1x128xf32> to vector<1x128xf32>
    %c0_i32 = arith.constant 0 : i32
    %6 = arith.cmpi eq, %arg1, %c0_i32 : i32
    %7 = arith.extui %6 : i1 to i32
    %c0_i32_8 = arith.constant 0 : i32
    %8 = arith.cmpi ne, %7, %c0_i32_8 : i32
    scf.if %8 {
      %c0_52 = arith.constant 0 : index
      %c0_53 = arith.constant 0 : index
      %c0_54 = arith.constant 0 : index
      %101 = vector.load %arg2[%c0_52, %c0_53, %c0_54] : memref<8x16x128xbf16, #tpu.memory_space<vmem>>, vector<8x16x128xbf16>
      %102 = vector.shape_cast %101 : vector<8x16x128xbf16> to vector<128x128xbf16>
      %cst_55 = arith.constant dense<0.000000e+00> : vector<128x128xf32>
      %103 = tpu.matmul %102, %1, %cst_55 {dimension_numbers = #tpu.dot_dimension_numbers<[1], [0], [0], [1], [0, 0, 1, 1], [], []>} : vector<128x128xbf16>, vector<128x128xbf16>, vector<128x128xf32> -> vector<128x128xf32>
      %104 = vector.broadcast %5 : vector<1x128xf32> to vector<128x128xf32>
      %105 = arith.addf %103, %104 : vector<128x128xf32>
      %106 = vector.shape_cast %105 : vector<128x128xf32> to vector<8x16x128xf32>
      %c0_56 = arith.constant 0 : index
      %c0_57 = arith.constant 0 : index
      %c0_58 = arith.constant 0 : index
      %107 = vector.load %arg6[%c0_56, %c0_57, %c0_58] : memref<8x16x128xf32, #tpu.memory_space<vmem>>, vector<8x16x128xf32>
      tpu.vector_store %arg6[%c0_56, %c0_57, %c0_58], %106 {strides = array<i32>} : memref<8x16x128xf32, #tpu.memory_space<vmem>>, vector<8x16x128xf32>,
    } else {
    }
    %c0_i32_9 = arith.constant 0 : i32
    %9 = arith.cmpi ne, %arg1, %c0_i32_9 : i32
    %10 = arith.extui %9 : i1 to i32
    %c0_i32_10 = arith.constant 0 : i32
    %11 = arith.cmpi ne, %10, %c0_i32_10 : i32
    scf.if %11 {
      %c0_52 = arith.constant 0 : index
      %c0_53 = arith.constant 0 : index
      %c0_54 = arith.constant 0 : index
      %101 = vector.load %arg6[%c0_52, %c0_53, %c0_54] : memref<8x16x128xf32, #tpu.memory_space<vmem>>, vector<8x16x128xf32>
      %102 = vector.shape_cast %101 : vector<8x16x128xf32> to vector<128x128xf32>
      %103 = arith.truncf %102 : vector<128x128xf32> to vector<128x128xbf16>
      %cst_55 = arith.constant dense<0.000000e+00> : vector<128x128xf32>
      %104 = tpu.matmul %103, %1, %cst_55 {dimension_numbers = #tpu.dot_dimension_numbers<[1], [0], [0], [1], [0, 0, 1, 1], [], []>} : vector<128x128xbf16>, vector<128x128xbf16>, vector<128x128xf32> -> vector<128x128xf32>
      %105 = vector.broadcast %5 : vector<1x128xf32> to vector<128x128xf32>
      %106 = arith.addf %104, %105 : vector<128x128xf32>
      %107 = vector.shape_cast %106 : vector<128x128xf32> to vector<8x16x128xf32>
      %c0_56 = arith.constant 0 : index
      %c0_57 = arith.constant 0 : index
      %c0_58 = arith.constant 0 : index
      %108 = vector.load %arg6[%c0_56, %c0_57, %c0_58] : memref<8x16x128xf32, #tpu.memory_space<vmem>>, vector<8x16x128xf32>
      tpu.vector_store %arg6[%c0_56, %c0_57, %c0_58], %107 {strides = array<i32>} : memref<8x16x128xf32, #tpu.memory_space<vmem>>, vector<8x16x128xf32>,
    } else {
    }
    %cst = arith.constant 0.000000e+00 : f32
    %12 = vector.broadcast %cst : f32 to vector<16x128xf32>
    %c0_i32_11 = arith.constant 0 : i32
    %13 = arith.index_cast %c0_i32_11 : i32 to index
    %c0_12 = arith.constant 0 : index
    %c0_13 = arith.constant 0 : index
    %14 = vector.load %arg6[%13, %c0_12, %c0_13] : memref<8x16x128xf32, #tpu.memory_space<vmem>>, vector<1x16x128xf32>
    %15 = vector.shape_cast %14 : vector<1x16x128xf32> to vector<16x128xf32>
    %16 = arith.truncf %12 : vector<16x128xf32> to vector<16x128xbf16>
    %cst_14 = arith.constant dense<0.000000e+00> : vector<16x128xf32>
    %17 = tpu.matmul %16, %3, %cst_14 {dimension_numbers = #tpu.dot_dimension_numbers<[1], [0], [0], [1], [0, 0, 1, 1], [], []>} : vector<16x128xbf16>, vector<128x128xbf16>, vector<16x128xf32> -> vector<16x128xf32>
    %18 = arith.addf %15, %17 : vector<16x128xf32>
    %19 = math.tanh %18 : vector<16x128xf32>
    %20 = arith.index_cast %c0_i32_11 : i32 to index
    %c0_15 = arith.constant 0 : index
    %c0_16 = arith.constant 0 : index
    %21 = vector.load %arg6[%20, %c0_15, %c0_16] : memref<8x16x128xf32, #tpu.memory_space<vmem>>, vector<1x16x128xf32>
    %22 = vector.shape_cast %21 : vector<1x16x128xf32> to vector<16x128xf32>
    %23 = vector.shape_cast %19 : vector<16x128xf32> to vector<1x16x128xf32>
    tpu.vector_store %arg6[%20, %c0_15, %c0_16], %23 {strides = array<i32>} : memref<8x16x128xf32, #tpu.memory_space<vmem>>, vector<1x16x128xf32>,
    %c1_i32 = arith.constant 1 : i32
    %24 = arith.index_cast %c1_i32 : i32 to index
    %c0_17 = arith.constant 0 : index
    %c0_18 = arith.constant 0 : index
    %25 = vector.load %arg6[%24, %c0_17, %c0_18] : memref<8x16x128xf32, #tpu.memory_space<vmem>>, vector<1x16x128xf32>
    %26 = vector.shape_cast %25 : vector<1x16x128xf32> to vector<16x128xf32>
    %27 = arith.truncf %19 : vector<16x128xf32> to vector<16x128xbf16>
    %cst_19 = arith.constant dense<0.000000e+00> : vector<16x128xf32>
    %28 = tpu.matmul %27, %3, %cst_19 {dimension_numbers = #tpu.dot_dimension_numbers<[1], [0], [0], [1], [0, 0, 1, 1], [], []>} : vector<16x128xbf16>, vector<128x128xbf16>, vector<16x128xf32> -> vector<16x128xf32>
    %29 = arith.addf %26, %28 : vector<16x128xf32>
    %30 = math.tanh %29 : vector<16x128xf32>
    %31 = arith.index_cast %c1_i32 : i32 to index
    %c0_20 = arith.constant 0 : index
    %c0_21 = arith.constant 0 : index
    %32 = vector.load %arg6[%31, %c0_20, %c0_21] : memref<8x16x128xf32, #tpu.memory_space<vmem>>, vector<1x16x128xf32>
    %33 = vector.shape_cast %32 : vector<1x16x128xf32> to vector<16x128xf32>
    %34 = vector.shape_cast %30 : vector<16x128xf32> to vector<1x16x128xf32>
    tpu.vector_store %arg6[%31, %c0_20, %c0_21], %34 {strides = array<i32>} : memref<8x16x128xf32, #tpu.memory_space<vmem>>, vector<1x16x128xf32>,
    %c2_i32 = arith.constant 2 : i32
    %35 = arith.index_cast %c2_i32 : i32 to index
    %c0_22 = arith.constant 0 : index
    %c0_23 = arith.constant 0 : index
    %36 = vector.load %arg6[%35, %c0_22, %c0_23] : memref<8x16x128xf32, #tpu.memory_space<vmem>>, vector<1x16x128xf32>
    %37 = vector.shape_cast %36 : vector<1x16x128xf32> to vector<16x128xf32>
    %38 = arith.truncf %30 : vector<16x128xf32> to vector<16x128xbf16>
    %cst_24 = arith.constant dense<0.000000e+00> : vector<16x128xf32>
    %39 = tpu.matmul %38, %3, %cst_24 {dimension_numbers = #tpu.dot_dimension_numbers<[1], [0], [0], [1], [0, 0, 1, 1], [], []>} : vector<16x128xbf16>, vector<128x128xbf16>, vector<16x128xf32> -> vector<16x128xf32>
    %40 = arith.addf %37, %39 : vector<16x128xf32>
    %41 = math.tanh %40 : vector<16x128xf32>
    %42 = arith.index_cast %c2_i32 : i32 to index
    %c0_25 = arith.constant 0 : index
    %c0_26 = arith.constant 0 : index
    %43 = vector.load %arg6[%42, %c0_25, %c0_26] : memref<8x16x128xf32, #tpu.memory_space<vmem>>, vector<1x16x128xf32>
    %44 = vector.shape_cast %43 : vector<1x16x128xf32> to vector<16x128xf32>
    %45 = vector.shape_cast %41 : vector<16x128xf32> to vector<1x16x128xf32>
    tpu.vector_store %arg6[%42, %c0_25, %c0_26], %45 {strides = array<i32>} : memref<8x16x128xf32, #tpu.memory_space<vmem>>, vector<1x16x128xf32>,
    %c3_i32 = arith.constant 3 : i32
    %46 = arith.index_cast %c3_i32 : i32 to index
    %c0_27 = arith.constant 0 : index
    %c0_28 = arith.constant 0 : index
    %47 = vector.load %arg6[%46, %c0_27, %c0_28] : memref<8x16x128xf32, #tpu.memory_space<vmem>>, vector<1x16x128xf32>
    %48 = vector.shape_cast %47 : vector<1x16x128xf32> to vector<16x128xf32>
    %49 = arith.truncf %41 : vector<16x128xf32> to vector<16x128xbf16>
    %cst_29 = arith.constant dense<0.000000e+00> : vector<16x128xf32>
    %50 = tpu.matmul %49, %3, %cst_29 {dimension_numbers = #tpu.dot_dimension_numbers<[1], [0], [0], [1], [0, 0, 1, 1], [], []>} : vector<16x128xbf16>, vector<128x128xbf16>, vector<16x128xf32> -> vector<16x128xf32>
    %51 = arith.addf %48, %50 : vector<16x128xf32>
    %52 = math.tanh %51 : vector<16x128xf32>
    %53 = arith.index_cast %c3_i32 : i32 to index
    %c0_30 = arith.constant 0 : index
    %c0_31 = arith.constant 0 : index
    %54 = vector.load %arg6[%53, %c0_30, %c0_31] : memref<8x16x128xf32, #tpu.memory_space<vmem>>, vector<1x16x128xf32>
    %55 = vector.shape_cast %54 : vector<1x16x128xf32> to vector<16x128xf32>
    %56 = vector.shape_cast %52 : vector<16x128xf32> to vector<1x16x128xf32>
    tpu.vector_store %arg6[%53, %c0_30, %c0_31], %56 {strides = array<i32>} : memref<8x16x128xf32, #tpu.memory_space<vmem>>, vector<1x16x128xf32>,
    %c4_i32 = arith.constant 4 : i32
    %57 = arith.index_cast %c4_i32 : i32 to index
    %c0_32 = arith.constant 0 : index
    %c0_33 = arith.constant 0 : index
    %58 = vector.load %arg6[%57, %c0_32, %c0_33] : memref<8x16x128xf32, #tpu.memory_space<vmem>>, vector<1x16x128xf32>
    %59 = vector.shape_cast %58 : vector<1x16x128xf32> to vector<16x128xf32>
    %60 = arith.truncf %52 : vector<16x128xf32> to vector<16x128xbf16>
    %cst_34 = arith.constant dense<0.000000e+00> : vector<16x128xf32>
    %61 = tpu.matmul %60, %3, %cst_34 {dimension_numbers = #tpu.dot_dimension_numbers<[1], [0], [0], [1], [0, 0, 1, 1], [], []>} : vector<16x128xbf16>, vector<128x128xbf16>, vector<16x128xf32> -> vector<16x128xf32>
    %62 = arith.addf %59, %61 : vector<16x128xf32>
    %63 = math.tanh %62 : vector<16x128xf32>
    %64 = arith.index_cast %c4_i32 : i32 to index
    %c0_35 = arith.constant 0 : index
    %c0_36 = arith.constant 0 : index
    %65 = vector.load %arg6[%64, %c0_35, %c0_36] : memref<8x16x128xf32, #tpu.memory_space<vmem>>, vector<1x16x128xf32>
    %66 = vector.shape_cast %65 : vector<1x16x128xf32> to vector<16x128xf32>
    %67 = vector.shape_cast %63 : vector<16x128xf32> to vector<1x16x128xf32>
    tpu.vector_store %arg6[%64, %c0_35, %c0_36], %67 {strides = array<i32>} : memref<8x16x128xf32, #tpu.memory_space<vmem>>, vector<1x16x128xf32>,
    %c5_i32 = arith.constant 5 : i32
    %68 = arith.index_cast %c5_i32 : i32 to index
    %c0_37 = arith.constant 0 : index
    %c0_38 = arith.constant 0 : index
    %69 = vector.load %arg6[%68, %c0_37, %c0_38] : memref<8x16x128xf32, #tpu.memory_space<vmem>>, vector<1x16x128xf32>
    %70 = vector.shape_cast %69 : vector<1x16x128xf32> to vector<16x128xf32>
    %71 = arith.truncf %63 : vector<16x128xf32> to vector<16x128xbf16>
    %cst_39 = arith.constant dense<0.000000e+00> : vector<16x128xf32>
    %72 = tpu.matmul %71, %3, %cst_39 {dimension_numbers = #tpu.dot_dimension_numbers<[1], [0], [0], [1], [0, 0, 1, 1], [], []>} : vector<16x128xbf16>, vector<128x128xbf16>, vector<16x128xf32> -> vector<16x128xf32>
    %73 = arith.addf %70, %72 : vector<16x128xf32>
    %74 = math.tanh %73 : vector<16x128xf32>
    %75 = arith.index_cast %c5_i32 : i32 to index
    %c0_40 = arith.constant 0 : index
    %c0_41 = arith.constant 0 : index
    %76 = vector.load %arg6[%75, %c0_40, %c0_41] : memref<8x16x128xf32, #tpu.memory_space<vmem>>, vector<1x16x128xf32>
    %77 = vector.shape_cast %76 : vector<1x16x128xf32> to vector<16x128xf32>
    %78 = vector.shape_cast %74 : vector<16x128xf32> to vector<1x16x128xf32>
    tpu.vector_store %arg6[%75, %c0_40, %c0_41], %78 {strides = array<i32>} : memref<8x16x128xf32, #tpu.memory_space<vmem>>, vector<1x16x128xf32>,
    %c6_i32 = arith.constant 6 : i32
    %79 = arith.index_cast %c6_i32 : i32 to index
    %c0_42 = arith.constant 0 : index
    %c0_43 = arith.constant 0 : index
    %80 = vector.load %arg6[%79, %c0_42, %c0_43] : memref<8x16x128xf32, #tpu.memory_space<vmem>>, vector<1x16x128xf32>
    %81 = vector.shape_cast %80 : vector<1x16x128xf32> to vector<16x128xf32>
    %82 = arith.truncf %74 : vector<16x128xf32> to vector<16x128xbf16>
    %cst_44 = arith.constant dense<0.000000e+00> : vector<16x128xf32>
    %83 = tpu.matmul %82, %3, %cst_44 {dimension_numbers = #tpu.dot_dimension_numbers<[1], [0], [0], [1], [0, 0, 1, 1], [], []>} : vector<16x128xbf16>, vector<128x128xbf16>, vector<16x128xf32> -> vector<16x128xf32>
    %84 = arith.addf %81, %83 : vector<16x128xf32>
    %85 = math.tanh %84 : vector<16x128xf32>
    %86 = arith.index_cast %c6_i32 : i32 to index
    %c0_45 = arith.constant 0 : index
    %c0_46 = arith.constant 0 : index
    %87 = vector.load %arg6[%86, %c0_45, %c0_46] : memref<8x16x128xf32, #tpu.memory_space<vmem>>, vector<1x16x128xf32>
    %88 = vector.shape_cast %87 : vector<1x16x128xf32> to vector<16x128xf32>
    %89 = vector.shape_cast %85 : vector<16x128xf32> to vector<1x16x128xf32>
    tpu.vector_store %arg6[%86, %c0_45, %c0_46], %89 {strides = array<i32>} : memref<8x16x128xf32, #tpu.memory_space<vmem>>, vector<1x16x128xf32>,
    %c7_i32 = arith.constant 7 : i32
    %90 = arith.index_cast %c7_i32 : i32 to index
    %c0_47 = arith.constant 0 : index
    %c0_48 = arith.constant 0 : index
    %91 = vector.load %arg6[%90, %c0_47, %c0_48] : memref<8x16x128xf32, #tpu.memory_space<vmem>>, vector<1x16x128xf32>
    %92 = vector.shape_cast %91 : vector<1x16x128xf32> to vector<16x128xf32>
    %93 = arith.truncf %85 : vector<16x128xf32> to vector<16x128xbf16>
    %cst_49 = arith.constant dense<0.000000e+00> : vector<16x128xf32>
    %94 = tpu.matmul %93, %3, %cst_49 {dimension_numbers = #tpu.dot_dimension_numbers<[1], [0], [0], [1], [0, 0, 1, 1], [], []>} : vector<16x128xbf16>, vector<128x128xbf16>, vector<16x128xf32> -> vector<16x128xf32>
    %95 = arith.addf %92, %94 : vector<16x128xf32>
    %96 = math.tanh %95 : vector<16x128xf32>
    %97 = arith.index_cast %c7_i32 : i32 to index
    %c0_50 = arith.constant 0 : index
    %c0_51 = arith.constant 0 : index
    %98 = vector.load %arg6[%97, %c0_50, %c0_51] : memref<8x16x128xf32, #tpu.memory_space<vmem>>, vector<1x16x128xf32>
    %99 = vector.shape_cast %98 : vector<1x16x128xf32> to vector<16x128xf32>
    %100 = vector.shape_cast %96 : vector<16x128xf32> to vector<1x16x128xf32>
    tpu.vector_store %arg6[%97, %c0_50, %c0_51], %100 {strides = array<i32>} : memref<8x16x128xf32, #tpu.memory_space<vmem>>, vector<1x16x128xf32>,
    %c8_i32 = arith.constant 8 : i32
    return
  }
  func.func @transform_0(%arg0: i32, %arg1: i32) -> (i32, i32, i32) {
    %c0_i32 = arith.constant 0 : i32
    %c0_i32_0 = arith.constant 0 : i32
    %c0_i32_1 = arith.constant 0 : i32
    return %c0_i32, %arg0, %c0_i32_0 : i32, i32, i32
  }
  func.func @transform_1(%arg0: i32, %arg1: i32) -> (i32, i32, i32) {
    %c0_i32 = arith.constant 0 : i32
    %c0_i32_0 = arith.constant 0 : i32
    %c0_i32_1 = arith.constant 0 : i32
    return %arg1, %c0_i32, %c0_i32_0 : i32, i32, i32
  }
  func.func @transform_2(%arg0: i32, %arg1: i32) -> (i32, i32, i32) {
    %c0_i32 = arith.constant 0 : i32
    %c0_i32_0 = arith.constant 0 : i32
    %c0_i32_1 = arith.constant 0 : i32
    return %arg1, %c0_i32, %c0_i32_0 : i32, i32, i32
  }
  func.func @transform_3(%arg0: i32, %arg1: i32) -> (i32, i32, i32) {
    %c0_i32 = arith.constant 0 : i32
    %c0_i32_0 = arith.constant 0 : i32
    %c0_i32_1 = arith.constant 0 : i32
    return %arg1, %c0_i32, %c0_i32_0 : i32, i32, i32
  }
  func.func @transform_4(%arg0: i32, %arg1: i32) -> (i32, i32, i32) {
    %c0_i32 = arith.constant 0 : i32
    %c0_i32_0 = arith.constant 0 : i32
    %c0_i32_1 = arith.constant 0 : i32
    return %c0_i32, %arg0, %c0_i32_0 : i32, i32, i32
  }
}

</mosaic_0001>

<bundles_post_ra>
// kernel: tpu_custom_call.1
= control target key start
LH: loop header
LB: loop body
LE: loop exit
PB: predicated region body
PF: predicated region fallthrough
CT: control target
= control target key end

     0   :  { %9 = vsyncpa [#allocation3], 0  ;;  %s2601_s0 = inlined_call_operand.hbm [shape: bf16[8,16,128], index: 0, kind: input, shape index: {}]   ;;  %s2602_s1 = inlined_call_operand.hbm [shape: bf16[2,128,128], index: 1, kind: input, shape index: {}]   ;;  %s2603_s2 = inlined_call_operand.hbm [shape: bf16[2,128,128], index: 2, kind: input, shape index: {}]   ;;  %s2604_s3 = inlined_call_operand.vmem [shape: f32[2,1,128], index: 3, kind: input, shape index: {}]   ;;  %s2605_s4 = inlined_call_operand.hbm [shape: f32[8,16,128], index: 4, kind: output, shape index: {}]  }
   0x1   :  { %10 = vsyncpa [#allocation6], 0 }
   0x2   :  { %12 = vsyncpa [#allocation6 + $0x1], 0 }
   0x3   :  { %13 = vsyncpa [#allocation4], 0  ;;  %s2080_s15 = smov 0   ;;  %s2082_s16 = smov 0  }
   0x4   :  { %s2084_s17 = smov 0   ;;  %s2086_s18 = smov 0  }
   0x5   :  { %s2088_s19 = smov 0   ;;  %s2090_s20 = smov 0  }
   0x6 LB: > { %s28_s21 = sadd.s32 1, %s2038_s19  ;;  %s64_s22 = sadd.s32 1, %s2030_s17  ;;  %s2042_s20 = sphi %s2090_s20, %s19_s20   ;;  %s2038_s19 = sphi %s2088_s19, %s2624_s19   ;;  %s2034_s18 = sphi %s2086_s18, %s2623_s18   ;;  %s2030_s17 = sphi %s2084_s17, %s2622_s17   ;;  %s2026_s16 = sphi %s2082_s16, %s2621_s16   ;;  %s2022_s15 = sphi %s2080_s15, %s2620_s15  }
   0x7   : > { %p29_p0 = scmp.ge.s32.totalorder %s28_s21, 2  ;;  %p71_p1 = scmp.ne.s32.totalorder %s2030_s17, %s2026_s16 }
   0x8   : > { %p72_p2 = scmp.eq.s32.totalorder %s2042_s20, 0  ;;  %p1769_p5 = scmp.lt.s32.totalorder %s2042_s20, 2 }
   0x9   : > { %s2626_s21 = smov (%p29_p0, %s28_s21), 0  ;;  %s195_s25 = sand.u32 1, %s2042_s20  }
   0xa   : > { %p2117_p3 = por %p72_p2, %p71_p1  ;;  %s61_s24 = ssub.s32 %s2038_s19, %s2626_s21 }
   0xb   : > { %p62_p4 = scmp.eq.s32.totalorder %s61_s24, 0  ;;  %s197_s26 = sand.u32 1, %s2030_s17  }
   0xc   : > { %s1335_s28 = sshll.u32 %s197_s26, 6  ;;  %s1383_s29 = sshll.u32 %s2038_s19, 10 }
   0xd   : > { %s2127_s27 = scalar_select %p62_p4, %s2030_s17, %s64_s22  }
   0xe   : > { %s2133_s6 = scalar_lea.hbm %s2602_s1, %s1383_s29  ;;  %s199_s7 = scalar_lea.vmem [#allocation5], %s1335_s28 }
   0xf   : > { %s206_s8 = sshll.u32 %s199_s7, 4  ;;  %p2139_p6 = pnand %p1769_p5, %p2117_p3  ;;  %s2135_s8 = int_to_ptr.vmem [resolvable:$true] %s206_s8 }
  0x10   : > { %s2146_s12 = scalar_lea.hbm %s2603_s2, %s1383_s29  ;;  %s220_s13 = scalar_lea.vmem [#allocation7], %s1335_s28 }
  0x11   : > { %s2148_s14 = sshll.u32 %s220_s13, 4  ;;  %s2150_s22 = scalar_lea.sflag [#allocation6], %s195_s25  ;;  %s2182_s14 = int_to_ptr.vmem [resolvable:$true] %s2148_s14 }
  0x12   : > { %s1870_s24 = scalar_lea.hbm %s2133_s6, 1024  ;;  %p1872_p8 = pneg %p2139_p6 }
  0x13   : > { %p1871_p7 = scmp.ne.s32.totalorder %s2133_s6, %s1870_s24  ;;  %s1875_s30 = scalar_lea.hbm %s2602_s1, 2048 }
  0x14   : > { %p1876_p11 = scmp.lt.u32.totalorder %s2133_s6, %s2602_s1  ;;  %p1877_p12 = scmp.lt.u32.totalorder %s1875_s30, %s1870_s24 }
  0x15   : > { %p1873_p9 = pnand %p1872_p8, %p1871_p7  ;;  %p1879_p0 = scmp.lt.u32.totalorder %s1870_s24, %s2133_s6 }
  0x16   : > { %p1878_p13 = por %p1877_p12, %p1876_p11 }
  0x17   : > { %p1874_p10 = pneg %p1873_p9 }
  0x18   : > { %p1880_p1 = por %p1879_p0, %p1878_p13 }
  0x1a   : > { %p1881_p2 = pnand %p1880_p1, %p1874_p10 }
  0x1c   : > { %1884 = shalt.err (!%p1881_p2)
}
  0x1d   : > { %s1885_s25 = scalar_lea.vmem %s2135_s8, 1024  ;;  %s2044_s28 = smov [#allocation5]  }
  0x1e   : > { %p1886_p3 = scmp.ne.s32.totalorder %s2135_s8, %s1885_s25  ;;  %s1890_s7 = sshll.u32 %s2044_s28, 4  ;;  %s1891_s7 = int_to_ptr.vmem [resolvable:$false] %s1890_s7 }
  0x1f   : > { %s1892_s10 = scalar_lea.vmem %s1891_s7, 2048  ;;  %p1893_p7 = scmp.lt.s32.totalorder %s2135_s8, %s1891_s7 }
  0x20   : > { %p1888_p4 = pnand %p1886_p3, %p1872_p8  ;;  %p1894_p9 = scmp.lt.s32.totalorder %s1892_s10, %s1885_s25 }
  0x22   : > { %p1889_p5 = pneg %p1888_p4  ;;  %p1895_p11 = por %p1894_p9, %p1893_p7 }
  0x24   : > { %p1896_p12 = pnand %p1895_p11, %p1889_p5 }
  0x26   : > { %1899 = shalt.err (!%p1896_p12)
}
  0x27   : > { %s2045_s11 = smov 64   ;;  %s2046_s13 = smov 4  }
  0x28   : > { %1764 = dma.hbm_to_vmem [thread:$0]  (!%p2139_p6), %s2133_s6, 1024, %s2135_s8, %s2150_s22, %s2045_s11, %s2045_s11, %s2046_s13  }
  0x29   : > { %s2185_s24 = sadd.s32 4294967295, %s2042_s20   ;;  %p77_p10 = scmp.ne.s32.totalorder %s2026_s16, %s2022_s15 }
  0x2a   : > { %p2606_p13 = scmp.eq.s32.totalorder %s2185_s24, 0  ;;  %p1332_p0 = scmp.ge.s32.totalorder %s2042_s20, 1 }
  0x2b   : > { %p166_p1 = scmp.lt.s32.totalorder %s2042_s20, 3  ;;  %s2047_s6 = smov [#allocation2]  }
  0x2c   : > { %p2194_p2 = por %p2606_p13, %p77_p10  ;;  %s2202_s8 = sshll.u32 %s2047_s6, 4  ;;  %s182_s8 = int_to_ptr.vmem [resolvable:$true] %s2202_s8 }
  0x2d   : > { %p2198_p3 = pnand %p1332_p0, %p166_p1  ;;  %s1900_s15 = scalar_lea.hbm %s2146_s12, 1024 }
  0x2e   : > { %s2611_s23 = scalar_select %p2194_p2, 1, 0 }
  0x2f   : > { %s2612_s26 = scalar_select %p2198_p3, 1, 0 }
  0x30   : > { %p1901_p5 = scmp.ne.s32.totalorder %s2146_s12, %s1900_s15  ;;  %s1905_s29 = scalar_lea.hbm %s2603_s2, 2048 }
  0x31   : > { %p1906_p11 = scmp.lt.u32.totalorder %s2146_s12, %s2603_s2  ;;  %p1907_p12 = scmp.lt.u32.totalorder %s1905_s29, %s1900_s15 }
  0x32   : > { %p1903_p7 = pnand %p1901_p5, %p1872_p8  ;;  %p1909_p0 = scmp.lt.u32.totalorder %s1900_s15, %s2146_s12 }
  0x33   : > { %p1908_p10 = por %p1907_p12, %p1906_p11 }
  0x34   : > { %p1904_p9 = pneg %p1903_p7 }
  0x35   : > { %p1910_p1 = por %p1909_p0, %p1908_p10 }
  0x37   : > { %p1911_p13 = pnand %p1910_p1, %p1904_p9 }
  0x39   : > { %1914 = shalt.err (!%p1911_p13)
}
  0x3a   : > { %s1915_s7 = scalar_lea.vmem %s2182_s14, 1024  ;;  %s2048_s10 = smov [#allocation7]  }
  0x3b   : > { %p1916_p5 = scmp.ne.s32.totalorder %s2182_s14, %s1915_s7  ;;  %s1920_s6 = sshll.u32 %s2048_s10, 4  ;;  %s1921_s6 = int_to_ptr.vmem [resolvable:$false] %s1920_s6 }
  0x3c   : > { %s1922_s30 = scalar_lea.vmem %s1921_s6, 2048  ;;  %p1923_p2 = scmp.lt.s32.totalorder %s2182_s14, %s1921_s6 }
  0x3d   : > { %p1918_p7 = pnand %p1916_p5, %p1872_p8  ;;  %p1924_p11 = scmp.lt.s32.totalorder %s1922_s30, %s1915_s7 }
  0x3f   : > { %p1919_p4 = pneg %p1918_p7  ;;  %p1925_p12 = por %p1924_p11, %p1923_p2 }
  0x41   : > { %p1926_p10 = pnand %p1925_p12, %p1919_p4 }
  0x43   : > { %1929 = shalt.err (!%p1926_p10)
}
  0x44   : > { %1767 = dma.hbm_to_vmem [thread:$0]  (!%p2139_p6), %s2146_s12, 1024, %s2182_s14, %s2150_s22, %s2045_s11, %s2045_s11, %s2046_s13  }
  0x45   : > { %p2613_p8 = scmp.eq.s32.totalorder %s2185_s24, 0  ;;  %p2614_p13 = pneg %p2198_p3 }
  0x46   : > { %s1930_s29 = scalar_lea.hbm %s2601_s0, 1024 }
  0x47   : > { %p2239_p9 = pnand %p2614_p13, %p2613_p8  ;;  %p1931_p2 = scmp.ne.s32.totalorder %s2601_s0, %s1930_s29 }
  0x48   : > { %p1937_p1 = scmp.lt.u32.totalorder %s1930_s29, %s2601_s0 }
  0x49   : > { %p1932_p4 = pneg %p2239_p9 }
  0x4b   : > { %p1933_p6 = pnand %p1932_p4, %p1931_p2 }
  0x4d   : > { %p1934_p0 = pneg %p1933_p6 }
  0x4f   : > { %p1939_p5 = pnand %p1937_p1, %p1934_p0 }
  0x51   : > { %1942 = shalt.err (!%p1939_p5)
}
  0x52   : > { %s1943_s22 = scalar_lea.vmem %s182_s8, 1024  ;;  %p1951_p10 = scmp.lt.s32.totalorder %s182_s8, %s182_s8 }
  0x53   : > { %p1944_p7 = scmp.ne.s32.totalorder %s182_s8, %s1943_s22  ;;  %p1952_p8 = scmp.lt.s32.totalorder %s1943_s22, %s1943_s22 }
  0x55   : > { %p1946_p11 = pnand %p1944_p7, %p1932_p4  ;;  %p1953_p13 = por %p1952_p8, %p1951_p10 }
  0x57   : > { %p1947_p12 = pneg %p1946_p11 }
  0x59   : > { %p1954_p3 = pnand %p1953_p13, %p1947_p12 }
  0x5b   : > { %1957 = shalt.err (!%p1954_p3)
}
  0x5c   : > { %1760 = dma.hbm_to_vmem [thread:$0]  (!%p2239_p9), %s2601_s0, 1024, %s182_s8, [#allocation3], %s2045_s11, %s2045_s11, %s2046_s13  }
  0x5d   : > { %p2616_p2 = scmp.ne.s32.totalorder %s2612_s26, 0 }
  0x5e   : > { %p2617_p4 = scmp.eq.s32.totalorder (!%p2616_p2), %s2185_s24, 0 }
  0x5f   : > { %245 = sbr.rel (%p2616_p2) target bundleno = 2516 (0x9d4), region = 36 }
  0x66   : > { %2009 = dma.done.wait (%p2617_p4), [#allocation3], 1024   ;;  %p2618_p6 = pmov %p2617_p4 }
  0x67   : > { %s251_s6 = sand.u32 1, %s2185_s24   ;;  %s253_s30 = sand.u32 1, %s2026_s16  }
  0x68   : > { %2011 = vsyncadd (%p2618_p6), [#allocation3], 4294966272  ;;  %s1343_s15 = sshll.u32 %s253_s30, 6  ;;  %s252_s5 = scalar_lea.sflag [#allocation6], %s251_s6 }
  0x69   : > { %s255_s9 = scalar_lea.vmem [#allocation5], %s1343_s15  ;;  %p2619_p3 = scmp.ne.s32.totalorder %s2611_s23, 0 }
  0x6b   : > { %2013 = dma.done.wait (%p2619_p3), %s252_s5, 2048  }
  0x6c   : > { %2015 = vsyncadd (%p2619_p3), %s252_s5, 4294965248  ;;  %p293_p9 = scmp.lt.s32.totalorder %s2034_s18, 1  ;;  %v2278_v0 = vld [vmem:[%s255_s9] sm:$0xf]  ;;  %v2280_v1 = vld [vmem:[%s255_s9 + $0x4] sm:$0xf] }
  0x6d   : > { %v2282_v2 = vld [vmem:[%s255_s9 + $0x8] sm:$0xf]  ;;  %v2284_v3 = vld [vmem:[%s255_s9 + $0xc] sm:$0xf]  ;;  %v2286_v4 = vld [vmem:[%s255_s9 + $0x10] sm:$0xf] }
  0x6e   : > { %s2276_s11 = scalar_select %p293_p9, %s2034_s18, 1  ;;  %v2288_v5 = vld [vmem:[%s255_s9 + $0x14] sm:$0xf]  ;;  %v2290_v6 = vld [vmem:[%s255_s9 + $0x18] sm:$0xf] }
  0x6f   : > { %v2292_v7 = vld [vmem:[%s255_s9 + $0x1c] sm:$0xf]  ;;  %v2294_v8 = vld [vmem:[%s255_s9 + $0x20] sm:$0xf]  ;;  %v2296_v9 = vld [vmem:[%s255_s9 + $0x24] sm:$0xf] }
  0x70   : > { %v2298_v10 = vld [vmem:[%s255_s9 + $0x28] sm:$0xf]  ;;  %v2300_v11 = vld [vmem:[%s255_s9 + $0x2c] sm:$0xf]  ;;  %v2302_v12 = vld [vmem:[%s255_s9 + $0x30] sm:$0xf]  ;;  %s295_s8 = scalar_lea.vmem %s2604_s3, %s2276_s11 }
  0x71   : > { %v2304_v13 = vld [vmem:[%s255_s9 + $0x34] sm:$0xf]  ;;  %v2306_v14 = vld [vmem:[%s255_s9 + $0x38] sm:$0xf]  ;;  %v2308_v15 = vld [vmem:[%s255_s9 + $0x3c] sm:$0xf] }
  0x72   : > { %s264_s13 = scalar_lea.vmem [#allocation7], %s1343_s15  ;;  %v2346_v32 = vld [vmem:[%s295_s8] sm:$0x1]  ;;  %p1345_p0 = scmp.ne.s32.totalorder %s2034_s18, 0 }
  0x73   : > { %v2310_v16 = vld [vmem:[%s264_s13] sm:$0xf]  ;;  %v2312_v17 = vld [vmem:[%s264_s13 + $0x4] sm:$0xf]  ;;  %v2314_v18 = vld [vmem:[%s264_s13 + $0x8] sm:$0xf]  ;;  %v1354_v33 = vcombine.low (!%p1345_p0), %v2278_v0, %v2280_v1  ;;  %v1355_v34 = vcombine.low (!%p1345_p0), %v2282_v2, %v2284_v3  ;;  %v1356_v37 = vcombine.low (!%p1345_p0), %v2286_v4, %v2288_v5  ;;  %v1357_v38 = vcombine.low (!%p1345_p0), %v2290_v6, %v2292_v7 }
  0x74   : > { %v2316_v19 = vld [vmem:[%s264_s13 + $0xc] sm:$0xf]  ;;  %v2318_v20 = vld [vmem:[%s264_s13 + $0x10] sm:$0xf]  ;;  %v2324_v21 = vld [vmem:[%s264_s13 + $0x14] sm:$0xf]  ;;  %v1358_v39 = vcombine.low (!%p1345_p0), %v2294_v8, %v2296_v9  ;;  %v1359_v40 = vcombine.low (!%p1345_p0), %v2298_v10, %v2300_v11  ;;  %v1360_v41 = vcombine.low (!%p1345_p0), %v2302_v12, %v2304_v13  ;;  %v1361_v42 = vcombine.low (!%p1345_p0), %v2306_v14, %v2308_v15 }
  0x75   : > { %v2326_v22 = vld [vmem:[%s264_s13 + $0x18] sm:$0xf]  ;;  %v2328_v23 = vld [vmem:[%s264_s13 + $0x1c] sm:$0xf]  ;;  %v2330_v24 = vld [vmem:[%s264_s13 + $0x20] sm:$0xf]  ;;  %1489 = vmatprep.subr.bf16.mxu0 (!%p1345_p0), %v1354_v33  ;;  %1713 = vmatprep.subr.bf16.mxu1 (!%p1345_p0), %v1354_v33  ;;  %v352_v49 = vlaneseq (!%p1345_p0) }
  0x76   : > { %v2332_v25 = vld [vmem:[%s264_s13 + $0x24] sm:$0xf]  ;;  %v2334_v26 = vld [vmem:[%s264_s13 + $0x28] sm:$0xf]  ;;  %v2336_v27 = vld [vmem:[%s264_s13 + $0x2c] sm:$0xf]  ;;  %1490 = vmatpush3.bf16.msra.mxu0 (!%p1345_p0), %v1354_v33  ;;  %1721 = vmatpush3.bf16.msra.mxu1 (!%p1345_p0), %v1354_v33 }
  0x77   : > { %v2338_v28 = vld [vmem:[%s264_s13 + $0x30] sm:$0xf]  ;;  %v2340_v29 = vld [vmem:[%s264_s13 + $0x34] sm:$0xf]  ;;  %v2342_v30 = vld [vmem:[%s264_s13 + $0x38] sm:$0xf]  ;;  %1491 = vmatprep.subr.bf16.mxu0 (!%p1345_p0), %v1355_v34  ;;  %1714 = vmatprep.subr.bf16.mxu1 (!%p1345_p0), %v1355_v34 }
  0x78   : > { %v2344_v31 = vld [vmem:[%s264_s13 + $0x3c] sm:$0xf]  ;;  %334 = sbr.rel (%p1345_p0) target bundleno = 376 (0x178), region = 52  ;;  %v1830_v35 = vld [vmem:[#allocation2] sm:$0xff] (!%p1345_p0)   ;;  %v1832_v43 = vld [vmem:[#allocation2 + $0x8] sm:$0xff] (!%p1345_p0)   ;;  %v353_v50 = vshrl.u32 (!%p1345_p0), %v352_v49, 7 }
  0x79   : > { %v1831_v36 = vld [vmem:[#allocation2 + $0x20] sm:$0xff] (!%p1345_p0)   ;;  %1505 = vmatprep.mubr.bf16.mxu0 (!%p1345_p0), %v1830_v35  ;;  %v1833_v44 = vld [vmem:[#allocation2 + $0x28] sm:$0xff] (!%p1345_p0)   ;;  %v1834_v45 = vld [vmem:[#allocation2 + $0x10] sm:$0xff] (!%p1345_p0)  }
  0x7a   : > { %1513 = vmatprep.mubr.bf16.mxu1 (!%p1345_p0), %v1831_v36  ;;  %1492 = vmatpush3.bf16.msra.mxu0 (!%p1345_p0), %v1355_v34  ;;  %v1835_v46 = vld [vmem:[#allocation2 + $0x30] sm:$0xff] (!%p1345_p0)   ;;  %v1836_v47 = vld [vmem:[#allocation2 + $0x18] sm:$0xff] (!%p1345_p0)   ;;  %v354_v51 = vsub.s32 (!%p1345_p0), 0, %v353_v50 }
  0x7b   : > { %1722 = vmatpush3.bf16.msra.mxu1 (!%p1345_p0), %v1355_v34  ;;  %1493 = vmatprep.subr.bf16.mxu0 (!%p1345_p0), %v1356_v37  ;;  %v1837_v48 = vld [vmem:[#allocation2 + $0x38] sm:$0xff] (!%p1345_p0)  }
  0x7c   : > { %1715 = vmatprep.subr.bf16.mxu1 (!%p1345_p0), %v1356_v37  ;;  %v355_v52 = vrot.slane (!%p1345_p0), %v2346_v32, %v354_v51 }
  0x7e   : > { %1494 = vmatpush3.bf16.msra.mxu0 (!%p1345_p0), %v1356_v37 }
  0x7f   : > { %1723 = vmatpush3.bf16.msra.mxu1 %v1356_v37  ;;  %1495 = vmatprep.subr.bf16.mxu0 %v1357_v38 }
  0x80   : > { %1716 = vmatprep.subr.bf16.mxu1 %v1357_v38 }
  0x82   : > { %1496 = vmatpush3.bf16.msra.mxu0 %v1357_v38 }
  0x83   : > { %1724 = vmatpush3.bf16.msra.mxu1 %v1357_v38  ;;  %1497 = vmatprep.subr.bf16.mxu0 %v1358_v39 }
  0x84   : > { %1717 = vmatprep.subr.bf16.mxu1 %v1358_v39 }
  0x86   : > { %1498 = vmatpush3.bf16.msra.mxu0 %v1358_v39 }
  0x87   : > { %1725 = vmatpush3.bf16.msra.mxu1 %v1358_v39  ;;  %1499 = vmatprep.subr.bf16.mxu0 %v1359_v40 }
  0x88   : > { %1718 = vmatprep.subr.bf16.mxu1 %v1359_v40 }
  0x8a   : > { %1500 = vmatpush3.bf16.msra.mxu0 %v1359_v40 }
  0x8b   : > { %1726 = vmatpush3.bf16.msra.mxu1 %v1359_v40  ;;  %1501 = vmatprep.subr.bf16.mxu0 %v1360_v41 }
  0x8c   : > { %1719 = vmatprep.subr.bf16.mxu1 %v1360_v41 }
  0x8e   : > { %1502 = vmatpush3.bf16.msra.mxu0 %v1360_v41 }
  0x8f   : > { %1727 = vmatpush3.bf16.msra.mxu1 %v1360_v41  ;;  %1503 = vmatprep.subr.bf16.mxu0 %v1361_v42 }
  0x90   : > { %1720 = vmatprep.subr.bf16.mxu1 %v1361_v42 }
  0x92   : > { %1504 = vmatpush3.bf16.msra.mxu0 %v1361_v42 }
  0x93   : > { %1728 = vmatpush3.bf16.msra.mxu1 %v1361_v42 }
  0x95   : > { %1506 = vmatmul.mubr.bf16.vlgmr.msra.gmra.mrb[0].mxu0 %v1832_v43 }
  0x96   : > { %1514 = vmatmul.mubr.bf16.vlgmr.msra.gmra.mrb[0].mxu1 %v1833_v44  ;;  %1509 = vmatprep.mubr.bf16.mxu0 %v1834_v45 }
  0x97   : > { %1517 = vmatprep.mubr.bf16.mxu1 %v1835_v46 }
  0x9d   : > { %1510 = vmatmul.mubr.bf16.gmra.mrb[4].mxu0 %v1836_v47 }
  0x9e   : > { %1518 = vmatmul.mubr.bf16.gmra.mrb[4].mxu1 %v1837_v48 }
 0x168   : > { %v1507_v53 = vpop.f32.mrb[0].mxu0 }
 0x169   : > { %v1515_v54 = vpop.f32.mrb[0].mxu1  ;;  %v496_v55 = vadd.f32 %v1507_v53, %v355_v52  ;;  %v487_v57 = vpop.f32.mrb[1].mxu0 }
 0x16a   : > { %v528_v56 = vadd.f32 %v1515_v54, %v355_v52  ;;  %v519_v58 = vpop.f32.mrb[1].mxu1  ;;  %v488_v59 = vadd.f32 %v487_v57, %v355_v52  ;;  %v1508_v61 = vpop.f32.mrb[2].mxu0 }
 0x16b   : > { %v520_v60 = vadd.f32 %v519_v58, %v355_v52  ;;  %v1516_v62 = vpop.f32.mrb[2].mxu1  ;;  %552 = vst [vmem:[#allocation8 + $0x10] sm:$0xff] %v496_v55  ;;  %v499_v63 = vadd.f32 %v1508_v61, %v355_v52  ;;  %v490_v34 = vpop.f32.mrb[3].mxu0 }
 0x16c   : > { %560 = vst [vmem:[#allocation8 + $0x50] sm:$0xff] %v528_v56  ;;  %v531_v33 = vadd.f32 %v1516_v62, %v355_v52  ;;  %v522_v35 = vpop.f32.mrb[3].mxu1  ;;  %550 = vst [vmem:[#allocation8] sm:$0xff] %v488_v59  ;;  %v491_v36 = vadd.f32 %v490_v34, %v355_v52 }
 0x16d   : > { %558 = vst [vmem:[#allocation8 + $0x40] sm:$0xff] %v520_v60  ;;  %v523_v37 = vadd.f32 %v522_v35, %v355_v52  ;;  %553 = vst [vmem:[#allocation8 + $0x18] sm:$0xff] %v499_v63 }
 0x16e   : > { %561 = vst [vmem:[#allocation8 + $0x58] sm:$0xff] %v531_v33  ;;  %551 = vst [vmem:[#allocation8 + $0x8] sm:$0xff] %v491_v36 }
 0x16f   : > { %559 = vst [vmem:[#allocation8 + $0x48] sm:$0xff] %v523_v37 }
 0x170   : > { %v1511_v38 = vpop.f32.mrb[4].mxu0 }
 0x171   : > { %v1519_v39 = vpop.f32.mrb[4].mxu1  ;;  %v512_v40 = vadd.f32 %v1511_v38, %v355_v52  ;;  %v503_v42 = vpop.f32.mrb[5].mxu0 }
 0x172   : > { %v544_v41 = vadd.f32 %v1519_v39, %v355_v52  ;;  %v535_v43 = vpop.f32.mrb[5].mxu1  ;;  %v504_v44 = vadd.f32 %v503_v42, %v355_v52  ;;  %v1512_v46 = vpop.f32.mrb[6].mxu0 }
 0x173   : > { %v536_v45 = vadd.f32 %v535_v43, %v355_v52  ;;  %v1520_v47 = vpop.f32.mrb[6].mxu1  ;;  %556 = vst [vmem:[#allocation8 + $0x30] sm:$0xff] %v512_v40  ;;  %v515_v48 = vadd.f32 %v1512_v46, %v355_v52  ;;  %v506_v50 = vpop.f32.mrb[7].mxu0 }
 0x174   : > { %564 = vst [vmem:[#allocation8 + $0x70] sm:$0xff] %v544_v41  ;;  %v547_v49 = vadd.f32 %v1520_v47, %v355_v52  ;;  %v538_v51 = vpop.f32.mrb[7].mxu1  ;;  %554 = vst [vmem:[#allocation8 + $0x20] sm:$0xff] %v504_v44  ;;  %v507_v53 = vadd.f32 %v506_v50, %v355_v52 }
 0x175   : > { %562 = vst [vmem:[#allocation8 + $0x60] sm:$0xff] %v536_v45  ;;  %v539_v54 = vadd.f32 %v538_v51, %v355_v52  ;;  %557 = vst [vmem:[#allocation8 + $0x38] sm:$0xff] %v515_v48 }
 0x176   : > { %565 = vst [vmem:[#allocation8 + $0x78] sm:$0xff] %v547_v49  ;;  %555 = vst [vmem:[#allocation8 + $0x28] sm:$0xff] %v507_v53 }
 0x177   : > { %563 = vst [vmem:[#allocation8 + $0x68] sm:$0xff] %v539_v54 }
 0x178 PF: > { %p1362_p1 = scmp.eq.s32.totalorder %s2034_s18, 0 }
 0x179   : > { %v1363_v55 = vcombine.low (!%p1362_p1), %v2278_v0, %v2280_v1  ;;  %v1364_v56 = vcombine.low (!%p1362_p1), %v2282_v2, %v2284_v3  ;;  %v570_v57 = vld [vmem:[#allocation8] sm:$0xff] (!%p1362_p1)  ;;  %v571_v58 = vld [vmem:[#allocation8 + $0x8] sm:$0xff] (!%p1362_p1)  ;;  %v1365_v62 = vcombine.low (!%p1362_p1), %v2286_v4, %v2288_v5  ;;  %v1366_v0 = vcombine.low (!%p1362_p1), %v2290_v6, %v2292_v7  ;;  %v572_v5 = vld [vmem:[#allocation8 + $0x10] sm:$0xff] (!%p1362_p1) }
 0x17a   : > { %569 = sbr.rel (%p1362_p1) target bundleno = 637 (0x27d), region = 56  ;;  %v578_v59 = vld [vmem:[#allocation8 + $0x40] sm:$0xff] (!%p1362_p1)  ;;  %v579_v60 = vld [vmem:[#allocation8 + $0x48] sm:$0xff] (!%p1362_p1)  ;;  %v586_v52 = vpack.c.bf16 (!%p1362_p1), %v571_v58, %v570_v57  ;;  %v1367_v1 = vcombine.low (!%p1362_p1), %v2294_v8, %v2296_v9  ;;  %v1368_v2 = vcombine.low (!%p1362_p1), %v2298_v10, %v2300_v11  ;;  %v1369_v3 = vcombine.low (!%p1362_p1), %v2302_v12, %v2304_v13  ;;  %v573_v6 = vld [vmem:[#allocation8 + $0x18] sm:$0xff] (!%p1362_p1) }
 0x17b   : > { %1521 = vmatprep.subr.bf16.mxu0 (!%p1362_p1), %v1363_v55  ;;  %1729 = vmatprep.subr.bf16.mxu1 (!%p1362_p1), %v1363_v55  ;;  %v590_v61 = vpack.c.bf16 (!%p1362_p1), %v579_v60, %v578_v59  ;;  %v1370_v4 = vcombine.low (!%p1362_p1), %v2306_v14, %v2308_v15  ;;  %v580_v7 = vld [vmem:[#allocation8 + $0x50] sm:$0xff] (!%p1362_p1)  ;;  %v581_v8 = vld [vmem:[#allocation8 + $0x58] sm:$0xff] (!%p1362_p1)  ;;  %v574_v9 = vld [vmem:[#allocation8 + $0x20] sm:$0xff] (!%p1362_p1)  ;;  %v587_v12 = vpack.c.bf16 (!%p1362_p1), %v573_v6, %v572_v5  ;;  %v595_v39 = vlaneseq (!%p1362_p1) }
 0x17c   : > { %1522 = vmatpush3.bf16.msra.mxu0 (!%p1362_p1), %v1363_v55  ;;  %1737 = vmatpush3.bf16.msra.mxu1 (!%p1362_p1), %v1363_v55  ;;  %v582_v11 = vld [vmem:[#allocation8 + $0x60] sm:$0xff] (!%p1362_p1)  ;;  %v591_v13 = vpack.c.bf16 (!%p1362_p1), %v581_v8, %v580_v7  ;;  %v576_v14 = vld [vmem:[#allocation8 + $0x30] sm:$0xff] (!%p1362_p1)  ;;  %v577_v15 = vld [vmem:[#allocation8 + $0x38] sm:$0xff] (!%p1362_p1) }
 0x17d   : > { %1523 = vmatprep.subr.bf16.mxu0 (!%p1362_p1), %v1364_v56  ;;  %1730 = vmatprep.subr.bf16.mxu1 (!%p1362_p1), %v1364_v56  ;;  %v575_v10 = vld [vmem:[#allocation8 + $0x28] sm:$0xff] (!%p1362_p1)  ;;  %v584_v35 = vld [vmem:[#allocation8 + $0x70] sm:$0xff] (!%p1362_p1)  ;;  %v585_v36 = vld [vmem:[#allocation8 + $0x78] sm:$0xff] (!%p1362_p1)  ;;  %v589_v37 = vpack.c.bf16 (!%p1362_p1), %v577_v15, %v576_v14  ;;  %v596_v40 = vshrl.u32 (!%p1362_p1), %v595_v39, 7 }
 0x17e   : > { %1537 = vmatprep.mubr.bf16.mxu0 (!%p1362_p1), %v586_v52  ;;  %1545 = vmatprep.mubr.bf16.mxu1 (!%p1362_p1), %v590_v61  ;;  %v583_v63 = vld [vmem:[#allocation8 + $0x68] sm:$0xff] (!%p1362_p1)  ;;  %v588_v33 = vpack.c.bf16 (!%p1362_p1), %v575_v10, %v574_v9  ;;  %v593_v38 = vpack.c.bf16 (!%p1362_p1), %v585_v36, %v584_v35 }
 0x17f   : > { %v592_v34 = vpack.c.bf16 (!%p1362_p1), %v583_v63, %v582_v11  ;;  %v597_v41 = vsub.s32 (!%p1362_p1), 0, %v596_v40 }
 0x180   : > { %1524 = vmatpush3.bf16.msra.mxu0 (!%p1362_p1), %v1364_v56  ;;  %1738 = vmatpush3.bf16.msra.mxu1 (!%p1362_p1), %v1364_v56 }
 0x181   : > { %1525 = vmatprep.subr.bf16.mxu0 %v1365_v62  ;;  %1731 = vmatprep.subr.bf16.mxu1 %v1365_v62  ;;  %v598_v42 = vrot.slane %v2346_v32, %v597_v41 }
 0x184   : > { %1526 = vmatpush3.bf16.msra.mxu0 %v1365_v62  ;;  %1739 = vmatpush3.bf16.msra.mxu1 %v1365_v62 }
 0x185   : > { %1527 = vmatprep.subr.bf16.mxu0 %v1366_v0  ;;  %1732 = vmatprep.subr.bf16.mxu1 %v1366_v0 }
 0x188   : > { %1528 = vmatpush3.bf16.msra.mxu0 %v1366_v0  ;;  %1740 = vmatpush3.bf16.msra.mxu1 %v1366_v0 }
 0x189   : > { %1529 = vmatprep.subr.bf16.mxu0 %v1367_v1  ;;  %1733 = vmatprep.subr.bf16.mxu1 %v1367_v1 }
 0x18c   : > { %1530 = vmatpush3.bf16.msra.mxu0 %v1367_v1  ;;  %1741 = vmatpush3.bf16.msra.mxu1 %v1367_v1 }
 0x18d   : > { %1531 = vmatprep.subr.bf16.mxu0 %v1368_v2  ;;  %1734 = vmatprep.subr.bf16.mxu1 %v1368_v2 }
 0x190   : > { %1532 = vmatpush3.bf16.msra.mxu0 %v1368_v2  ;;  %1742 = vmatpush3.bf16.msra.mxu1 %v1368_v2 }
 0x191   : > { %1533 = vmatprep.subr.bf16.mxu0 %v1369_v3  ;;  %1735 = vmatprep.subr.bf16.mxu1 %v1369_v3 }
 0x194   : > { %1534 = vmatpush3.bf16.msra.mxu0 %v1369_v3  ;;  %1743 = vmatpush3.bf16.msra.mxu1 %v1369_v3 }
 0x195   : > { %1535 = vmatprep.subr.bf16.mxu0 %v1370_v4  ;;  %1736 = vmatprep.subr.bf16.mxu1 %v1370_v4 }
 0x198   : > { %1536 = vmatpush3.bf16.msra.mxu0 %v1370_v4  ;;  %1744 = vmatpush3.bf16.msra.mxu1 %v1370_v4 }
 0x19b   : > { %1538 = vmatmul.mubr.bf16.vlgmr.msra.gmra.mrb[0].mxu0 %v587_v12  ;;  %1546 = vmatmul.mubr.bf16.vlgmr.msra.gmra.mrb[0].mxu1 %v591_v13 }
 0x19c   : > { %1541 = vmatprep.mubr.bf16.mxu0 %v588_v33  ;;  %1549 = vmatprep.mubr.bf16.mxu1 %v592_v34 }
 0x1a3   : > { %1542 = vmatmul.mubr.bf16.gmra.mrb[4].mxu0 %v589_v37  ;;  %1550 = vmatmul.mubr.bf16.gmra.mrb[4].mxu1 %v593_v38 }
 0x26e   : > { %v1539_v43 = vpop.f32.mrb[0].mxu0  ;;  %v1547_v44 = vpop.f32.mrb[0].mxu1 }
 0x26f   : > { %v691_v45 = vadd.f32 %v1539_v43, %v598_v42  ;;  %v723_v46 = vadd.f32 %v1547_v44, %v598_v42  ;;  %v682_v47 = vpop.f32.mrb[1].mxu0  ;;  %v714_v48 = vpop.f32.mrb[1].mxu1 }
 0x270   : > { %v683_v49 = vadd.f32 %v682_v47, %v598_v42  ;;  %v715_v50 = vadd.f32 %v714_v48, %v598_v42  ;;  %v1540_v51 = vpop.f32.mrb[2].mxu0  ;;  %v1548_v53 = vpop.f32.mrb[2].mxu1 }
 0x271   : > { %747 = vst [vmem:[#allocation8 + $0x10] sm:$0xff] %v691_v45  ;;  %755 = vst [vmem:[#allocation8 + $0x50] sm:$0xff] %v723_v46  ;;  %v694_v54 = vadd.f32 %v1540_v51, %v598_v42  ;;  %v726_v55 = vadd.f32 %v1548_v53, %v598_v42  ;;  %v685_v56 = vpop.f32.mrb[3].mxu0  ;;  %v717_v57 = vpop.f32.mrb[3].mxu1 }
 0x272   : > { %745 = vst [vmem:[#allocation8] sm:$0xff] %v683_v49  ;;  %753 = vst [vmem:[#allocation8 + $0x40] sm:$0xff] %v715_v50  ;;  %v686_v58 = vadd.f32 %v685_v56, %v598_v42  ;;  %v718_v32 = vadd.f32 %v717_v57, %v598_v42 }
 0x273   : > { %748 = vst [vmem:[#allocation8 + $0x18] sm:$0xff] %v694_v54  ;;  %756 = vst [vmem:[#allocation8 + $0x58] sm:$0xff] %v726_v55 }
 0x274   : > { %746 = vst [vmem:[#allocation8 + $0x8] sm:$0xff] %v686_v58  ;;  %754 = vst [vmem:[#allocation8 + $0x48] sm:$0xff] %v718_v32 }
 0x276   : > { %v1543_v59 = vpop.f32.mrb[4].mxu0  ;;  %v1551_v60 = vpop.f32.mrb[4].mxu1 }
 0x277   : > { %v707_v52 = vadd.f32 %v1543_v59, %v598_v42  ;;  %v739_v61 = vadd.f32 %v1551_v60, %v598_v42  ;;  %v698_v62 = vpop.f32.mrb[5].mxu0  ;;  %v730_v0 = vpop.f32.mrb[5].mxu1 }
 0x278   : > { %v699_v1 = vadd.f32 %v698_v62, %v598_v42  ;;  %v731_v2 = vadd.f32 %v730_v0, %v598_v42  ;;  %v1544_v3 = vpop.f32.mrb[6].mxu0  ;;  %v1552_v4 = vpop.f32.mrb[6].mxu1 }
 0x279   : > { %751 = vst [vmem:[#allocation8 + $0x30] sm:$0xff] %v707_v52  ;;  %759 = vst [vmem:[#allocation8 + $0x70] sm:$0xff] %v739_v61  ;;  %v710_v5 = vadd.f32 %v1544_v3, %v598_v42  ;;  %v742_v6 = vadd.f32 %v1552_v4, %v598_v42  ;;  %v701_v7 = vpop.f32.mrb[7].mxu0  ;;  %v733_v8 = vpop.f32.mrb[7].mxu1 }
 0x27a   : > { %749 = vst [vmem:[#allocation8 + $0x20] sm:$0xff] %v699_v1  ;;  %757 = vst [vmem:[#allocation8 + $0x60] sm:$0xff] %v731_v2  ;;  %v702_v9 = vadd.f32 %v701_v7, %v598_v42  ;;  %v734_v10 = vadd.f32 %v733_v8, %v598_v42 }
 0x27b   : > { %752 = vst [vmem:[#allocation8 + $0x38] sm:$0xff] %v710_v5  ;;  %760 = vst [vmem:[#allocation8 + $0x78] sm:$0xff] %v742_v6 }
 0x27c   : > { %750 = vst [vmem:[#allocation8 + $0x28] sm:$0xff] %v702_v9  ;;  %758 = vst [vmem:[#allocation8 + $0x68] sm:$0xff] %v734_v10 }
 0x27d PF: > { %v2386_v11 = vcombine.low %v2310_v16, %v2312_v17  ;;  %v2049_v63 = vmov 0.0   ;;  %v2392_v12 = vcombine.low %v2314_v18, %v2316_v19  ;;  %vm2050_vm0 = vmmov 0   ;;  %v859_v34 = vld [vmem:[#allocation8 + $0x10] sm:$0xff]  ;;  %v860_v15 = vld [vmem:[#allocation8 + $0x18] sm:$0xff]  ;;  %v1012_v1 = vld [vmem:[#allocation8 + $0x40] sm:$0xff]  ;;  %s2052_s18 = smov [#allocation8]  }
 0x27e   : > { %1553 = vmatprep.subr.bf16.mxu0 %v2049_v63  ;;  %1573 = vmatprep.subr.bf16.mxu1 %v2049_v63  ;;  %v2405_v16 = vcombine.low %v2318_v20, %v2324_v21  ;;  %v2413_v17 = vcombine.low %v2326_v22, %v2328_v23  ;;  %v2421_v18 = vcombine.low %v2330_v24, %v2332_v25  ;;  %v2051_v22 = vmov 0   ;;  %v761_v23 = vld [vmem:[#allocation8] sm:$0xff]  ;;  %v762_v25 = vld [vmem:[#allocation8 + $0x8] sm:$0xff]  ;;  %s1224_s29 = sshll.u32 %s2052_s18, 4  ;;  %p1771_p5 = scmp.eq.s32.totalorder %s2185_s24, 1  ;;  %s1225_s29 = int_to_ptr.vmem [resolvable:$true] %s1224_s29 }
 0x27f   : > { %1554 = vmatpush3.bf16.msra.mxu0 %v2386_v11  ;;  %1569 = vmatprep.mubr.msk.bf16.mxu0 %vm2050_vm0, %v2049_v63  ;;  %v2429_v19 = vcombine.low %v2334_v26, %v2336_v27  ;;  %v2437_v20 = vcombine.low %v2338_v28, %v2340_v29  ;;  %v2445_v21 = vcombine.low %v2342_v30, %v2344_v31  ;;  %v1013_v3 = vld [vmem:[#allocation8 + $0x48] sm:$0xff]  ;;  %s1958_s25 = scalar_lea.vmem %s1225_s29, 2048  ;;  %p1965_p10 = scmp.lt.s32.totalorder %s1225_s29, %s1225_s29 }
 0x280   : > { %1555 = vmatprep.subr.bf16.mxu0 %v2049_v63  ;;  %1574 = vmatpush3.bf16.msra.mxu1 %v2386_v11  ;;  %v961_v55 = vld [vmem:[#allocation8 + $0x30] sm:$0xff]  ;;  %p1959_p7 = scmp.ne.s32.totalorder %s1225_s29, %s1958_s25  ;;  %p1966_p8 = scmp.lt.s32.totalorder %s1958_s25, %s1958_s25 }
 0x281   : > { %1589 = vmatprep.mubr.msk.bf16.mxu1 %vm2050_vm0, %v2049_v63  ;;  %1575 = vmatprep.subr.bf16.mxu1 %v2049_v63  ;;  %v910_v43 = vld [vmem:[#allocation8 + $0x20] sm:$0xff] }
 0x282   : > { %v962_v57 = vld [vmem:[#allocation8 + $0x38] sm:$0xff]  ;;  %p1960_p11 = pnand %p1959_p7, %p1771_p5  ;;  %p1967_p13 = por %p1966_p8, %p1965_p10 }
 0x283   : > { %1556 = vmatpush3.bf16.msra.mxu0 %v2392_v12  ;;  %v911_v45 = vld [vmem:[#allocation8 + $0x28] sm:$0xff] }
 0x284   : > { %1557 = vmatprep.subr.bf16.mxu0 %v2049_v63  ;;  %1576 = vmatpush3.bf16.msra.mxu1 %v2392_v12  ;;  %p1961_p12 = pneg %p1960_p11 }
 0x285   : > { %1577 = vmatprep.subr.bf16.mxu1 %v2049_v63 }
 0x286   : > { %p1968_p2 = pnand %p1967_p13, %p1961_p12 }
 0x287   : > { %1558 = vmatpush3.bf16.msra.mxu0 %v2405_v16 }
 0x288   : > { %1559 = vmatprep.subr.bf16.mxu0 %v2049_v63  ;;  %1578 = vmatpush3.bf16.msra.mxu1 %v2405_v16 }
 0x289   : > { %1579 = vmatprep.subr.bf16.mxu1 %v2049_v63 }
 0x28b   : > { %1560 = vmatpush3.bf16.msra.mxu0 %v2413_v17 }
 0x28c   : > { %1561 = vmatprep.subr.bf16.mxu0 %v2049_v63  ;;  %1580 = vmatpush3.bf16.msra.mxu1 %v2413_v17 }
 0x28d   : > { %1581 = vmatprep.subr.bf16.mxu1 %v2049_v63 }
 0x28f   : > { %1562 = vmatpush3.bf16.msra.mxu0 %v2421_v18 }
 0x290   : > { %1563 = vmatprep.subr.bf16.mxu0 %v2049_v63  ;;  %1582 = vmatpush3.bf16.msra.mxu1 %v2421_v18 }
 0x291   : > { %1583 = vmatprep.subr.bf16.mxu1 %v2049_v63 }
 0x293   : > { %1564 = vmatpush3.bf16.msra.mxu0 %v2429_v19 }
 0x294   : > { %1565 = vmatprep.subr.bf16.mxu0 %v2049_v63  ;;  %1584 = vmatpush3.bf16.msra.mxu1 %v2429_v19 }
 0x295   : > { %1585 = vmatprep.subr.bf16.mxu1 %v2049_v63 }
 0x297   : > { %1566 = vmatpush3.bf16.msra.mxu0 %v2437_v20 }
 0x298   : > { %1567 = vmatprep.subr.bf16.mxu0 %v2049_v63  ;;  %1586 = vmatpush3.bf16.msra.mxu1 %v2437_v20 }
 0x299   : > { %1587 = vmatprep.subr.bf16.mxu1 %v2049_v63 }
 0x29b   : > { %1568 = vmatpush3.bf16.msra.mxu0 %v2445_v21 }
 0x29c   : > { %1593 = vmatprep.subr.bf16.mxu0 %v2049_v63  ;;  %1588 = vmatpush3.bf16.msra.mxu1 %v2445_v21 }
 0x29d   : > { %1613 = vmatprep.subr.bf16.mxu1 %v2049_v63 }
 0x29e   : > { %1570 = vmatmul.mubr.bf16.vlgmr.msra.gmra.mrb[0].mxu0 %v2051_v22 }
 0x29f   : > { %1594 = vmatpush3.bf16.msra.mxu0 %v2386_v11  ;;  %1609 = vmatprep.mubr.msk.bf16.mxu0 %vm2050_vm0, %v2049_v63 }
 0x2a0   : > { %1595 = vmatprep.subr.bf16.mxu0 %v2049_v63 }
 0x2a3   : > { %1596 = vmatpush3.bf16.msra.mxu0 %v2392_v12 }
 0x2a4   : > { %1597 = vmatprep.subr.bf16.mxu0 %v2049_v63 }
 0x2a7   : > { %1598 = vmatpush3.bf16.msra.mxu0 %v2405_v16 }
 0x2a8   : > { %1599 = vmatprep.subr.bf16.mxu0 %v2049_v63 }
 0x2ab   : > { %1600 = vmatpush3.bf16.msra.mxu0 %v2413_v17 }
 0x2ac   : > { %1601 = vmatprep.subr.bf16.mxu0 %v2049_v63 }
 0x2af   : > { %1602 = vmatpush3.bf16.msra.mxu0 %v2421_v18 }
 0x2b0   : > { %1603 = vmatprep.subr.bf16.mxu0 %v2049_v63 }
 0x2b3   : > { %1604 = vmatpush3.bf16.msra.mxu0 %v2429_v19 }
 0x2b4   : > { %1605 = vmatprep.subr.bf16.mxu0 %v2049_v63 }
 0x2b7   : > { %1606 = vmatpush3.bf16.msra.mxu0 %v2437_v20 }
 0x2b8   : > { %1607 = vmatprep.subr.bf16.mxu0 %v2049_v63 }
 0x2bb   : > { %1608 = vmatpush3.bf16.msra.mxu0 %v2445_v21 }
 0x2bc   : > { %1633 = vmatprep.subr.bf16.mxu0 %v2049_v63 }
 0x371   : > { %v845_v24 = vpop.f32.mrb[0].mxu0 }
 0x372   : > { %v852_v26 = vadd.f32 %v845_v24, %v761_v23  ;;  %v1571_v27 = vpop.f32.mrb[1].mxu0 }
 0x373   : > { %v848_v28 = vpop.f32.mrb[2].mxu0 }
 0x374   : > { %1838 = vtanh.f32 %v852_v26  ;;  %v853_v29 = vadd.f32 %v848_v28, %v762_v25  ;;  %v1572_v30 = vpop.f32.mrb[3].mxu0  ;;  %v1115_v28 = vld [vmem:[#allocation8 + $0x68] sm:$0xff] }
 0x376   : > { %1840 = vtanh.f32 %v853_v29 }
 0x37e   : > { %v1839_v31 = vpop.eup %1838 }
 0x37f   : > { %856 = vst [vmem:[#allocation8] sm:$0xff] %v1839_v31 }
 0x380   : > { %v1841_v13 = vpop.eup %1840 }
 0x381   : > { %857 = vst [vmem:[#allocation8 + $0x8] sm:$0xff] %v1841_v13  ;;  %v861_v33 = vpack.c.bf16 %v1841_v13, %v1839_v31 }
 0x383   : > { %1590 = vmatmul.mubr.bf16.vlgmr.msra.gmra.mrb[0].mxu1 %v861_v33 }
 0x384   : > { %1614 = vmatpush3.bf16.msra.mxu1 %v2386_v11  ;;  %1629 = vmatprep.mubr.msk.bf16.mxu1 %vm2050_vm0, %v2049_v63 }
 0x385   : > { %1615 = vmatprep.subr.bf16.mxu1 %v2049_v63 }
 0x388   : > { %1616 = vmatpush3.bf16.msra.mxu1 %v2392_v12 }
 0x389   : > { %1617 = vmatprep.subr.bf16.mxu1 %v2049_v63 }
 0x38c   : > { %1618 = vmatpush3.bf16.msra.mxu1 %v2405_v16 }
 0x38d   : > { %1619 = vmatprep.subr.bf16.mxu1 %v2049_v63 }
 0x390   : > { %1620 = vmatpush3.bf16.msra.mxu1 %v2413_v17 }
 0x391   : > { %1621 = vmatprep.subr.bf16.mxu1 %v2049_v63 }
 0x394   : > { %1622 = vmatpush3.bf16.msra.mxu1 %v2421_v18 }
 0x395   : > { %1623 = vmatprep.subr.bf16.mxu1 %v2049_v63 }
 0x398   : > { %1624 = vmatpush3.bf16.msra.mxu1 %v2429_v19 }
 0x399   : > { %1625 = vmatprep.subr.bf16.mxu1 %v2049_v63 }
 0x39c   : > { %1626 = vmatpush3.bf16.msra.mxu1 %v2437_v20 }
 0x39d   : > { %1627 = vmatprep.subr.bf16.mxu1 %v2049_v63 }
 0x3a0   : > { %1628 = vmatpush3.bf16.msra.mxu1 %v2445_v21 }
 0x3a1   : > { %1653 = vmatprep.subr.bf16.mxu1 %v2049_v63 }
 0x456   : > { %v896_v14 = vpop.f32.mrb[0].mxu1 }
 0x457   : > { %v903_v35 = vadd.f32 %v896_v14, %v859_v34  ;;  %v1591_v36 = vpop.f32.mrb[1].mxu1 }
 0x458   : > { %v899_v37 = vpop.f32.mrb[2].mxu1  ;;  %v1166_v36 = vld [vmem:[#allocation8 + $0x78] sm:$0xff] }
 0x459   : > { %1842 = vtanh.f32 %v903_v35  ;;  %v904_v38 = vadd.f32 %v899_v37, %v860_v15  ;;  %v1592_v39 = vpop.f32.mrb[3].mxu1  ;;  %v1165_v15 = vld [vmem:[#allocation8 + $0x70] sm:$0xff] }
 0x45b   : > { %1844 = vtanh.f32 %v904_v38 }
 0x463   : > { %v1843_v40 = vpop.eup %1842 }
 0x464   : > { %907 = vst [vmem:[#allocation8 + $0x10] sm:$0xff] %v1843_v40 }
 0x465   : > { %v1845_v41 = vpop.eup %1844 }
 0x466   : > { %908 = vst [vmem:[#allocation8 + $0x18] sm:$0xff] %v1845_v41  ;;  %v912_v42 = vpack.c.bf16 %v1845_v41, %v1843_v40 }
 0x468   : > { %1610 = vmatmul.mubr.bf16.vlgmr.msra.gmra.mrb[4].mxu0 %v912_v42 }
 0x469   : > { %1634 = vmatpush3.bf16.msra.mxu0 %v2386_v11  ;;  %1649 = vmatprep.mubr.msk.bf16.mxu0 %vm2050_vm0, %v2049_v63 }
 0x46a   : > { %1635 = vmatprep.subr.bf16.mxu0 %v2049_v63 }
 0x46d   : > { %1636 = vmatpush3.bf16.msra.mxu0 %v2392_v12 }
 0x46e   : > { %1637 = vmatprep.subr.bf16.mxu0 %v2049_v63 }
 0x471   : > { %1638 = vmatpush3.bf16.msra.mxu0 %v2405_v16 }
 0x472   : > { %1639 = vmatprep.subr.bf16.mxu0 %v2049_v63 }
 0x475   : > { %1640 = vmatpush3.bf16.msra.mxu0 %v2413_v17 }
 0x476   : > { %1641 = vmatprep.subr.bf16.mxu0 %v2049_v63 }
 0x479   : > { %1642 = vmatpush3.bf16.msra.mxu0 %v2421_v18 }
 0x47a   : > { %1643 = vmatprep.subr.bf16.mxu0 %v2049_v63 }
 0x47d   : > { %1644 = vmatpush3.bf16.msra.mxu0 %v2429_v19 }
 0x47e   : > { %1645 = vmatprep.subr.bf16.mxu0 %v2049_v63 }
 0x481   : > { %1646 = vmatpush3.bf16.msra.mxu0 %v2437_v20 }
 0x482   : > { %1647 = vmatprep.subr.bf16.mxu0 %v2049_v63 }
 0x485   : > { %1648 = vmatpush3.bf16.msra.mxu0 %v2445_v21 }
 0x486   : > { %1673 = vmatprep.subr.bf16.mxu0 %v2049_v63 }
 0x53b   : > { %v947_v44 = vpop.f32.mrb[4].mxu0 }
 0x53c   : > { %v954_v46 = vadd.f32 %v947_v44, %v910_v43  ;;  %v1611_v47 = vpop.f32.mrb[5].mxu0 }
 0x53d   : > { %v950_v48 = vpop.f32.mrb[6].mxu0 }
 0x53e   : > { %1846 = vtanh.f32 %v954_v46  ;;  %v955_v49 = vadd.f32 %v950_v48, %v911_v45  ;;  %v1612_v50 = vpop.f32.mrb[7].mxu0 }
 0x540   : > { %1848 = vtanh.f32 %v955_v49 }
 0x548   : > { %v1847_v51 = vpop.eup %1846 }
 0x549   : > { %958 = vst [vmem:[#allocation8 + $0x20] sm:$0xff] %v1847_v51 }
 0x54a   : > { %v1849_v53 = vpop.eup %1848 }
 0x54b   : > { %959 = vst [vmem:[#allocation8 + $0x28] sm:$0xff] %v1849_v53  ;;  %v963_v54 = vpack.c.bf16 %v1849_v53, %v1847_v51 }
 0x54d   : > { %1630 = vmatmul.mubr.bf16.vlgmr.msra.gmra.mrb[4].mxu1 %v963_v54 }
 0x54e   : > { %1654 = vmatpush3.bf16.msra.mxu1 %v2386_v11  ;;  %1669 = vmatprep.mubr.msk.bf16.mxu1 %vm2050_vm0, %v2049_v63 }
 0x54f   : > { %1655 = vmatprep.subr.bf16.mxu1 %v2049_v63 }
 0x552   : > { %1656 = vmatpush3.bf16.msra.mxu1 %v2392_v12 }
 0x553   : > { %1657 = vmatprep.subr.bf16.mxu1 %v2049_v63 }
 0x556   : > { %1658 = vmatpush3.bf16.msra.mxu1 %v2405_v16 }
 0x557   : > { %1659 = vmatprep.subr.bf16.mxu1 %v2049_v63 }
 0x55a   : > { %1660 = vmatpush3.bf16.msra.mxu1 %v2413_v17 }
 0x55b   : > { %1661 = vmatprep.subr.bf16.mxu1 %v2049_v63 }
 0x55e   : > { %1662 = vmatpush3.bf16.msra.mxu1 %v2421_v18 }
 0x55f   : > { %1663 = vmatprep.subr.bf16.mxu1 %v2049_v63 }
 0x562   : > { %1664 = vmatpush3.bf16.msra.mxu1 %v2429_v19 }
 0x563   : > { %1665 = vmatprep.subr.bf16.mxu1 %v2049_v63 }
 0x566   : > { %1666 = vmatpush3.bf16.msra.mxu1 %v2437_v20 }
 0x567   : > { %1667 = vmatprep.subr.bf16.mxu1 %v2049_v63 }
 0x56a   : > { %1668 = vmatpush3.bf16.msra.mxu1 %v2445_v21 }
 0x56b   : > { %1693 = vmatprep.subr.bf16.mxu1 %v2049_v63 }
 0x620   : > { %v998_v56 = vpop.f32.mrb[4].mxu1 }
 0x621   : > { %v1005_v58 = vadd.f32 %v998_v56, %v961_v55  ;;  %v1631_v32 = vpop.f32.mrb[5].mxu1 }
 0x622   : > { %v1001_v59 = vpop.f32.mrb[6].mxu1 }
 0x623   : > { %1850 = vtanh.f32 %v1005_v58  ;;  %v1006_v60 = vadd.f32 %v1001_v59, %v962_v57  ;;  %v1632_v52 = vpop.f32.mrb[7].mxu1 }
 0x625   : > { %1852 = vtanh.f32 %v1006_v60 }
 0x62d   : > { %v1851_v61 = vpop.eup %1850 }
 0x62e   : > { %1009 = vst [vmem:[#allocation8 + $0x30] sm:$0xff] %v1851_v61 }
 0x62f   : > { %v1853_v62 = vpop.eup %1852 }
 0x630   : > { %1010 = vst [vmem:[#allocation8 + $0x38] sm:$0xff] %v1853_v62  ;;  %v1014_v0 = vpack.c.bf16 %v1853_v62, %v1851_v61 }
 0x632   : > { %1650 = vmatmul.mubr.bf16.vlgmr.msra.gmra.mrb[8].mxu0 %v1014_v0 }
 0x633   : > { %1674 = vmatpush3.bf16.msra.mxu0 %v2386_v11  ;;  %1689 = vmatprep.mubr.msk.bf16.mxu0 %vm2050_vm0, %v2049_v63 }
 0x634   : > { %1675 = vmatprep.subr.bf16.mxu0 %v2049_v63 }
 0x637   : > { %1676 = vmatpush3.bf16.msra.mxu0 %v2392_v12 }
 0x638   : > { %1677 = vmatprep.subr.bf16.mxu0 %v2049_v63 }
 0x63b   : > { %1678 = vmatpush3.bf16.msra.mxu0 %v2405_v16 }
 0x63c   : > { %1679 = vmatprep.subr.bf16.mxu0 %v2049_v63 }
 0x63f   : > { %1680 = vmatpush3.bf16.msra.mxu0 %v2413_v17 }
 0x640   : > { %1681 = vmatprep.subr.bf16.mxu0 %v2049_v63 }
 0x643   : > { %1682 = vmatpush3.bf16.msra.mxu0 %v2421_v18 }
 0x644   : > { %1683 = vmatprep.subr.bf16.mxu0 %v2049_v63 }
 0x647   : > { %1684 = vmatpush3.bf16.msra.mxu0 %v2429_v19 }
 0x648   : > { %1685 = vmatprep.subr.bf16.mxu0 %v2049_v63 }
 0x64b   : > { %1686 = vmatpush3.bf16.msra.mxu0 %v2437_v20 }
 0x64c   : > { %1687 = vmatprep.subr.bf16.mxu0 %v2049_v63 }
 0x64f   : > { %1688 = vmatpush3.bf16.msra.mxu0 %v2445_v21 }
 0x705   : > { %v1049_v2 = vpop.f32.mrb[8].mxu0 }
 0x706   : > { %v1056_v4 = vadd.f32 %v1049_v2, %v1012_v1  ;;  %v1651_v5 = vpop.f32.mrb[9].mxu0 }
 0x707   : > { %v1052_v6 = vpop.f32.mrb[10].mxu0 }
 0x708   : > { %1854 = vtanh.f32 %v1056_v4  ;;  %v1057_v7 = vadd.f32 %v1052_v6, %v1013_v3  ;;  %v1652_v8 = vpop.f32.mrb[11].mxu0 }
 0x70a   : > { %1856 = vtanh.f32 %v1057_v7 }
 0x712   : > { %v1855_v9 = vpop.eup %1854 }
 0x713   : > { %1060 = vst [vmem:[#allocation8 + $0x40] sm:$0xff] %v1855_v9 }
 0x714   : > { %v1857_v10 = vpop.eup %1856 }
 0x715   : > { %1061 = vst [vmem:[#allocation8 + $0x48] sm:$0xff] %v1857_v10  ;;  %v1065_v22 = vpack.c.bf16 %v1857_v10, %v1855_v9 }
 0x717   : > { %1670 = vmatmul.mubr.bf16.vlgmr.msra.gmra.mrb[8].mxu1 %v1065_v22 }
 0x718   : > { %1694 = vmatpush3.bf16.msra.mxu1 %v2386_v11  ;;  %1709 = vmatprep.mubr.msk.bf16.mxu1 %vm2050_vm0, %v2049_v63  ;;  %v1063_v11 = vld [vmem:[#allocation8 + $0x50] sm:$0xff] }
 0x719   : > { %1695 = vmatprep.subr.bf16.mxu1 %v2049_v63 }
 0x71c   : > { %1696 = vmatpush3.bf16.msra.mxu1 %v2392_v12 }
 0x71d   : > { %1697 = vmatprep.subr.bf16.mxu1 %v2049_v63 }
 0x720   : > { %1698 = vmatpush3.bf16.msra.mxu1 %v2405_v16  ;;  %v1064_v16 = vld [vmem:[#allocation8 + $0x58] sm:$0xff] }
 0x721   : > { %1699 = vmatprep.subr.bf16.mxu1 %v2049_v63 }
 0x724   : > { %1700 = vmatpush3.bf16.msra.mxu1 %v2413_v17 }
 0x725   : > { %1701 = vmatprep.subr.bf16.mxu1 %v2049_v63 }
 0x728   : > { %1702 = vmatpush3.bf16.msra.mxu1 %v2421_v18 }
 0x729   : > { %1703 = vmatprep.subr.bf16.mxu1 %v2049_v63 }
 0x72c   : > { %1704 = vmatpush3.bf16.msra.mxu1 %v2429_v19 }
 0x72d   : > { %1705 = vmatprep.subr.bf16.mxu1 %v2049_v63 }
 0x730   : > { %1706 = vmatpush3.bf16.msra.mxu1 %v2437_v20  ;;  %v1114_v20 = vld [vmem:[#allocation8 + $0x60] sm:$0xff] }
 0x731   : > { %1707 = vmatprep.subr.bf16.mxu1 %v2049_v63 }
 0x734   : > { %1708 = vmatpush3.bf16.msra.mxu1 %v2445_v21 }
 0x7ea   : > { %v1100_v12 = vpop.f32.mrb[8].mxu1 }
 0x7eb   : > { %v1107_v17 = vadd.f32 %v1100_v12, %v1063_v11  ;;  %v1671_v23 = vpop.f32.mrb[9].mxu1 }
 0x7ec   : > { %v1103_v24 = vpop.f32.mrb[10].mxu1 }
 0x7ed   : > { %1858 = vtanh.f32 %v1107_v17  ;;  %v1108_v18 = vadd.f32 %v1103_v24, %v1064_v16  ;;  %v1672_v25 = vpop.f32.mrb[11].mxu1 }
 0x7ef   : > { %1860 = vtanh.f32 %v1108_v18 }
 0x7f7   : > { %v1859_v26 = vpop.eup %1858 }
 0x7f8   : > { %1111 = vst [vmem:[#allocation8 + $0x50] sm:$0xff] %v1859_v26 }
 0x7f9   : > { %v1861_v19 = vpop.eup %1860 }
 0x7fa   : > { %1112 = vst [vmem:[#allocation8 + $0x58] sm:$0xff] %v1861_v19  ;;  %v1116_v27 = vpack.c.bf16 %v1861_v19, %v1859_v26 }
 0x7fc   : > { %1690 = vmatmul.mubr.bf16.vlgmr.msra.gmra.mrb[12].mxu0 %v1116_v27 }
 0x8cf   : > { %v1151_v63 = vpop.f32.mrb[12].mxu0 }
 0x8d0   : > { %v1158_v21 = vadd.f32 %v1151_v63, %v1114_v20  ;;  %v1691_v29 = vpop.f32.mrb[13].mxu0 }
 0x8d1   : > { %v1154_v30 = vpop.f32.mrb[14].mxu0 }
 0x8d2   : > { %1862 = vtanh.f32 %v1158_v21  ;;  %v1159_v31 = vadd.f32 %v1154_v30, %v1115_v28  ;;  %v1692_v13 = vpop.f32.mrb[15].mxu0 }
 0x8d4   : > { %1864 = vtanh.f32 %v1159_v31 }
 0x8dc   : > { %v1863_v33 = vpop.eup %1862 }
 0x8dd   : > { %1162 = vst [vmem:[#allocation8 + $0x60] sm:$0xff] %v1863_v33 }
 0x8de   : > { %v1865_v34 = vpop.eup %1864 }
 0x8df   : > { %1163 = vst [vmem:[#allocation8 + $0x68] sm:$0xff] %v1865_v34  ;;  %v1167_v14 = vpack.c.bf16 %v1865_v34, %v1863_v33 }
 0x8e1   : > { %1710 = vmatmul.mubr.bf16.vlgmr.msra.gmra.mrb[12].mxu1 %v1167_v14 }
 0x9b4   : > { %v1202_v35 = vpop.f32.mrb[12].mxu1 }
 0x9b5   : > { %v1209_v37 = vadd.f32 %v1202_v35, %v1165_v15  ;;  %v1711_v38 = vpop.f32.mrb[13].mxu1 }
 0x9b6   : > { %v1205_v39 = vpop.f32.mrb[14].mxu1 }
 0x9b7   : > { %1866 = vtanh.f32 %v1209_v37  ;;  %v1210_v40 = vadd.f32 %v1205_v39, %v1166_v36  ;;  %v1712_v41 = vpop.f32.mrb[15].mxu1 }
 0x9b9   : > { %1868 = vtanh.f32 %v1210_v40 }
 0x9c1   : > { %v1867_v42 = vpop.eup %1866 }
 0x9c2   : > { %1213 = vst [vmem:[#allocation8 + $0x70] sm:$0xff] %v1867_v42 }
 0x9c3   : > { %v1869_v43 = vpop.eup %1868 }
 0x9c4   : > { %1214 = vst [vmem:[#allocation8 + $0x78] sm:$0xff] %v1869_v43 }
 0x9c5   : > { %1971 = shalt.err (!%p1968_p2)
}
 0x9c6   : > { %s1972_s14 = scalar_lea.hbm %s2605_s4, 2048 }
 0x9c7   : > { %p1973_p4 = scmp.ne.s32.totalorder %s2605_s4, %s1972_s14  ;;  %p1978_p9 = scmp.lt.u32.totalorder %s1972_s14, %s2605_s4 }
 0x9c9   : > { %p1974_p6 = pnand %p1973_p4, %p1771_p5 }
 0x9cb   : > { %p1975_p3 = pneg %p1974_p6 }
 0x9cd   : > { %p1980_p0 = pnand %p1978_p9, %p1975_p3 }
 0x9cf   : > { %1983 = shalt.err (!%p1980_p0)
}
 0x9d0   : > { %s2053_s30 = smov 128   ;;  %s2054_s15 = smov 8  }
 0x9d1   : > { %1754 = dma.vmem_to_hbm [thread:$0]  (%p1771_p5), %s1225_s29, 2048, %s2605_s4, [#allocation4], %s2053_s30, %s2053_s30, %s2054_s15  }
 0x9d2   : > { %2017 = dma.done.wait (%p1771_p5), [#allocation4], 2048  }
 0x9d3   : > { %2019 = vsyncadd (%p1771_p5), [#allocation4], 4294965248 }
 0x9d4 PF: > { %s19_s20 = sadd.s32 1, %s2042_s20   ;;  %s2620_s15 = smov %s2026_s16 }
 0x9d5   : > { %p16_p1 = scmp.ge.s32.totalorder %s19_s20, 4   ;;  %s2621_s16 = smov %s2030_s17 }
 0x9d6   : > { %s2622_s17 = smov %s2127_s27  ;;  %s2623_s18 = smov %s2038_s19 }
 0x9d7   : > { %s2624_s19 = smov %s2626_s21  ;;  %18 = sbr.rel (!%p16_p1) target bundleno = 6 (0x6), region = 109 }
 0x9de   :  { %1240 = vsyncpa [#allocation3], 1 }
 0x9df   :  { %1242 = vsyncpa [#allocation3 + $0x1], 1 }
 0x9e0   :  { %1243 = vsyncpa [#allocation6], 1 }
 0x9e1   :  { %1245 = vsyncpa [#allocation6 + $0x1], 1 }
 0x9e2   :  { %1246 = vsyncpa [#allocation4], 1 }
 0x9e3   :  { %1248 = vsyncpa [#allocation4 + $0x1], 1 }

</bundles_post_ra>
